<compile_context>
chip_gen: v7x
topology: tpu7x:2x2x1
jax: 0.10.0
libtpu: 0.0.40
codegen_flags: <defaults>
</compile_context>

<pallas_src>
import math
from functools import partial

import jax
import jax.numpy as jnp
from jax.experimental import pallas as pl
from jax.experimental.pallas import tpu as pltpu

VMEM_LIMIT = 48 * 1024 * 1024   # < 64 MiB physical on v7x, plenty on v5e/v6e
LN_EPS = 1e-5                   # PyTorch nn.LayerNorm default


def _pick_tile(dim, target, align):
    """Largest tile <= target that divides `dim` and is `align`-aligned,
    falling back to the full dim (always a legal BlockSpec extent)."""
    if dim <= target:
        return dim
    t = (target // align) * align
    while t >= align:
        if dim % t == 0:
            return t
        t -= align
    return dim


# ----------------------------------------------------------------------------
# Kernels
# ----------------------------------------------------------------------------

def _matmul_bias_kernel(x_ref, w_ref, b_ref, o_ref, acc_ref):
    """Tiled GEMM with bias: grid = (M tiles, N tiles, K tiles)."""
    k = pl.program_id(2)

    @pl.when(k == 0)
    def _():
        acc_ref[...] = jnp.zeros_like(acc_ref)

    acc_ref[...] += jnp.dot(x_ref[...], w_ref[...],
                            preferred_element_type=jnp.float32)

    @pl.when(k == pl.num_programs(2) - 1)
    def _():
        o_ref[...] = (acc_ref[...] + b_ref[...].astype(jnp.float32)).astype(o_ref.dtype)


def _matmul_residual_ln_kernel(x_ref, w_ref, b_ref, r_ref, g_ref, bln_ref,
                               o_ref, acc_ref, *, eps):
    """Fused: LayerNorm(residual + x @ W + b). Grid = (M tiles, K tiles)."""
    k = pl.program_id(1)

    @pl.when(k == 0)
    def _():
        acc_ref[...] = jnp.zeros_like(acc_ref)

    acc_ref[...] += jnp.dot(x_ref[...], w_ref[...],
                            preferred_element_type=jnp.float32)

    @pl.when(k == pl.num_programs(1) - 1)
    def _():
        y = (acc_ref[...] + b_ref[...].astype(jnp.float32)
             + r_ref[...].astype(jnp.float32))
        mu = jnp.mean(y, axis=-1, keepdims=True)
        var = jnp.mean(jnp.square(y - mu), axis=-1, keepdims=True)
        yn = (y - mu) * jax.lax.rsqrt(var + eps)
        o_ref[...] = (yn * g_ref[...].astype(jnp.float32)
                      + bln_ref[...].astype(jnp.float32)).astype(o_ref.dtype)


def _ffn_residual_ln_kernel(x_ref, w1_ref, b1_ref, w2_ref, b2_ref, r_ref,
                            g_ref, bln_ref, o_ref, acc_ref, *, eps):
    """Fused FFN block: LayerNorm(residual + relu(x@W1+b1)@W2 + b2).
    Grid = (M tiles, hidden tiles); hidden axis is the streamed reduction."""
    j = pl.program_id(1)

    @pl.when(j == 0)
    def _():
        acc_ref[...] = jnp.zeros_like(acc_ref)

    h = (jnp.dot(x_ref[...], w1_ref[...], preferred_element_type=jnp.float32)
         + b1_ref[...].astype(jnp.float32))
    h = jnp.maximum(h, 0.0)
    acc_ref[...] += jnp.dot(h.astype(x_ref.dtype), w2_ref[...],
                            preferred_element_type=jnp.float32)

    @pl.when(j == pl.num_programs(1) - 1)
    def _():
        y = (acc_ref[...] + b2_ref[...].astype(jnp.float32)
             + r_ref[...].astype(jnp.float32))
        mu = jnp.mean(y, axis=-1, keepdims=True)
        var = jnp.mean(jnp.square(y - mu), axis=-1, keepdims=True)
        yn = (y - mu) * jax.lax.rsqrt(var + eps)
        o_ref[...] = (yn * g_ref[...].astype(jnp.float32)
                      + bln_ref[...].astype(jnp.float32)).astype(o_ref.dtype)


def _flash_attn_kernel(q_ref, k_ref, v_ref, o_ref, m_sc, l_sc, acc_sc, *, scale):
    """Flash-style attention over all heads of one batch element per grid step.
    Blocks: q (1,H,tq,dk), k/v (1,H,tkv,dk); grid = (B, Sq tiles, Sk tiles)."""
    kv = pl.program_id(2)

    @pl.when(kv == 0)
    def _():
        m_sc[...] = jnp.full(m_sc.shape, -jnp.inf, jnp.float32)
        l_sc[...] = jnp.zeros(l_sc.shape, jnp.float32)
        acc_sc[...] = jnp.zeros(acc_sc.shape, jnp.float32)

    # keep inputs in their native dtype for the MXU; accumulate in f32
    q = q_ref[0]   # (H, tq, dk)
    k = k_ref[0]   # (H, tkv, dk)
    v = v_ref[0]   # (H, tkv, dk)

    s = jnp.einsum("hqd,hkd->hqk", q, k,
                   preferred_element_type=jnp.float32) * scale   # (H, tq, tkv) f32

    m_prev = m_sc[...]                                            # (H, tq, 1)
    m_new = jnp.maximum(m_prev, jnp.max(s, axis=-1, keepdims=True))
    alpha = jnp.exp(m_prev - m_new)
    p = jnp.exp(s - m_new)                                        # f32
    l_sc[...] = alpha * l_sc[...] + jnp.sum(p, axis=-1, keepdims=True)
    acc_sc[...] = alpha * acc_sc[...] + jnp.einsum(
        "hqk,hkd->hqd", p.astype(v.dtype), v, preferred_element_type=jnp.float32)
    m_sc[...] = m_new

    @pl.when(kv == pl.num_programs(2) - 1)
    def _():
        o_ref[0] = (acc_sc[...]
                    * pl.reciprocal(l_sc[...], approx=True)).astype(o_ref.dtype)


# ----------------------------------------------------------------------------
# pallas_call wrappers
# ----------------------------------------------------------------------------

def linear(x2d, w, b):
    """(M, K) @ (K, N) + (N,) -> (M, N), tiled + pipelined."""
    M, K = x2d.shape
    N = w.shape[1]
    tm = _pick_tile(M, 256, 8)
    tn = _pick_tile(N, 512, 128)
    tk = _pick_tile(K, 512, 128)
    grid = (M // tm, N // tn, K // tk)
    return pl.pallas_call(
        _matmul_bias_kernel,
        out_shape=jax.ShapeDtypeStruct((M, N), x2d.dtype),
        grid=grid,
        in_specs=[
            pl.BlockSpec((tm, tk), lambda i, j, k: (i, k)),
            pl.BlockSpec((tk, tn), lambda i, j, k: (k, j)),
            pl.BlockSpec((1, tn), lambda i, j, k: (0, j)),
        ],
        out_specs=pl.BlockSpec((tm, tn), lambda i, j, k: (i, j)),
        scratch_shapes=[pltpu.VMEM((tm, tn), jnp.float32)],
        compiler_params=pltpu.CompilerParams(
            dimension_semantics=("parallel", "parallel", "arbitrary"),
            vmem_limit_bytes=VMEM_LIMIT),
    )(x2d, w, b.reshape(1, N))


def linear_residual_ln(x2d, w, b, res2d, gamma, beta):
    """LayerNorm(res + x @ W + b); N (= d_model) kept whole so LN sees full rows."""
    M, K = x2d.shape
    D = w.shape[1]
    tm = _pick_tile(M, 256, 8)
    tk = _pick_tile(K, 512, 128)
    grid = (M // tm, K // tk)
    return pl.pallas_call(
        partial(_matmul_residual_ln_kernel, eps=LN_EPS),
        out_shape=jax.ShapeDtypeStruct((M, D), x2d.dtype),
        grid=grid,
        in_specs=[
            pl.BlockSpec((tm, tk), lambda i, k: (i, k)),
            pl.BlockSpec((tk, D), lambda i, k: (k, 0)),
            pl.BlockSpec((1, D), lambda i, k: (0, 0)),
            pl.BlockSpec((tm, D), lambda i, k: (i, 0)),
            pl.BlockSpec((1, D), lambda i, k: (0, 0)),
            pl.BlockSpec((1, D), lambda i, k: (0, 0)),
        ],
        out_specs=pl.BlockSpec((tm, D), lambda i, k: (i, 0)),
        scratch_shapes=[pltpu.VMEM((tm, D), jnp.float32)],
        compiler_params=pltpu.CompilerParams(
            dimension_semantics=("parallel", "arbitrary"),
            vmem_limit_bytes=VMEM_LIMIT),
    )(x2d, w, b.reshape(1, D), res2d, gamma.reshape(1, D), beta.reshape(1, D))


def ffn_residual_ln(x2d, w1, b1, w2, b2, res2d, gamma, beta):
    """Fused FFN + residual + LayerNorm, streaming the hidden dimension."""
    M, D = x2d.shape
    H = w1.shape[1]
    tm = _pick_tile(M, 256, 8)
    th = _pick_tile(H, 512, 128)
    grid = (M // tm, H // th)
    itemsize = jnp.dtype(x2d.dtype).itemsize
    cost = pl.CostEstimate(
        flops=4 * M * D * H,
        transcendentals=0,
        bytes_accessed=int(itemsize * (3 * M * D + w1.size + w2.size + H + D)))
    return pl.pallas_call(
        partial(_ffn_residual_ln_kernel, eps=LN_EPS),
        out_shape=jax.ShapeDtypeStruct((M, D), x2d.dtype),
        grid=grid,
        in_specs=[
            pl.BlockSpec((tm, D), lambda i, j: (i, 0)),
            pl.BlockSpec((D, th), lambda i, j: (0, j)),
            pl.BlockSpec((1, th), lambda i, j: (0, j)),
            pl.BlockSpec((th, D), lambda i, j: (j, 0)),
            pl.BlockSpec((1, D), lambda i, j: (0, 0)),
            pl.BlockSpec((tm, D), lambda i, j: (i, 0)),
            pl.BlockSpec((1, D), lambda i, j: (0, 0)),
            pl.BlockSpec((1, D), lambda i, j: (0, 0)),
        ],
        out_specs=pl.BlockSpec((tm, D), lambda i, j: (i, 0)),
        scratch_shapes=[pltpu.VMEM((tm, D), jnp.float32)],
        compiler_params=pltpu.CompilerParams(
            dimension_semantics=("parallel", "arbitrary"),
            vmem_limit_bytes=VMEM_LIMIT),
        cost_estimate=cost,
    )(x2d, w1, b1.reshape(1, H), w2, b2.reshape(1, D), res2d,
      gamma.reshape(1, D), beta.reshape(1, D))


def flash_attention(q, k, v):
    """q: (B, H, Sq, dk), k/v: (B, H, Sk, dk) -> (B, H, Sq, dk)."""
    B, H, Sq, dk = q.shape
    Sk = k.shape[2]
    scale = 1.0 / math.sqrt(dk)
    tq = _pick_tile(Sq, 256, 8)
    tkv = _pick_tile(Sk, 256, 8)
    grid = (B, Sq // tq, Sk // tkv)
    itemsize = jnp.dtype(q.dtype).itemsize
    cost = pl.CostEstimate(
        flops=4 * B * H * Sq * Sk * dk,
        transcendentals=B * H * Sq * Sk,
        bytes_accessed=int(itemsize * (2 * q.size + k.size + v.size)))
    return pl.pallas_call(
        partial(_flash_attn_kernel, scale=scale),
        out_shape=jax.ShapeDtypeStruct((B, H, Sq, dk), q.dtype),
        grid=grid,
        in_specs=[
            pl.BlockSpec((1, H, tq, dk), lambda b, qi, ki: (b, 0, qi, 0)),
            pl.BlockSpec((1, H, tkv, dk), lambda b, qi, ki: (b, 0, ki, 0)),
            pl.BlockSpec((1, H, tkv, dk), lambda b, qi, ki: (b, 0, ki, 0)),
        ],
        out_specs=pl.BlockSpec((1, H, tq, dk), lambda b, qi, ki: (b, 0, qi, 0)),
        scratch_shapes=[
            pltpu.VMEM((H, tq, 1), jnp.float32),    # running max
            pltpu.VMEM((H, tq, 1), jnp.float32),    # running denom
            pltpu.VMEM((H, tq, dk), jnp.float32),   # running output accumulator
        ],
        compiler_params=pltpu.CompilerParams(
            dimension_semantics=("parallel", "parallel", "arbitrary"),
            vmem_limit_bytes=VMEM_LIMIT),
        cost_estimate=cost,
    )(q, k, v)


# ----------------------------------------------------------------------------
# Decoder forward
# ----------------------------------------------------------------------------

def _split_heads(x, n_head):
    B, S, D = x.shape
    # TODO(synk): head split/merge transposes stay in XLA; with d_head < 128 the
    # per-head attention blocks remain lane-padded inside the kernel.
    return x.reshape(B, S, n_head, D // n_head).transpose(0, 2, 1, 3)


def _merge_heads(x):
    B, H, S, dk = x.shape
    return x.transpose(0, 2, 1, 3).reshape(B, S, H * dk)


def _attention_sublayer(x, kv_source, p, ln_g, ln_b, n_head, *, self_attn):
    B, Sq, D = x.shape
    Sk = kv_source.shape[1]
    x2d = x.reshape(B * Sq, D)
    if self_attn:
        qkv = linear(x2d, p["wqkv"], p["bqkv"])            # fused Q,K,V projection
        q = qkv[:, :D].reshape(B, Sq, D)
        k = qkv[:, D:2 * D].reshape(B, Sk, D)
        v = qkv[:, 2 * D:].reshape(B, Sk, D)
    else:
        c2d = kv_source.reshape(B * Sk, D)
        q = linear(x2d, p["wq"], p["bq"]).reshape(B, Sq, D)
        kv = linear(c2d, p["wkv"], p["bkv"])               # fused K,V projection
        k = kv[:, :D].reshape(B, Sk, D)
        v = kv[:, D:].reshape(B, Sk, D)

    attn = flash_attention(_split_heads(q, n_head),
                           _split_heads(k, n_head),
                           _split_heads(v, n_head))
    attn2d = _merge_heads(attn).reshape(B * Sq, D)

    # output projection + residual add + LayerNorm fused in one kernel
    out = linear_residual_ln(attn2d, p["wo"], p["bo"], x2d, ln_g, ln_b)
    return out.reshape(B, Sq, D)


def decoder_block(x, context, p, n_head):
    x = _attention_sublayer(x, x, p["self_attn"], p["ln1_g"], p["ln1_b"],
                            n_head, self_attn=True)
    x = _attention_sublayer(x, context, p["cross_attn"], p["ln2_g"], p["ln2_b"],
                            n_head, self_attn=False)
    B, S, D = x.shape
    x2d = x.reshape(B * S, D)
    out = ffn_residual_ln(x2d, p["w1"], p["b1"], p["w2"], p["b2"],
                          x2d, p["ln3_g"], p["ln3_b"])
    return out.reshape(B, S, D)


@partial(jax.jit, static_argnames=("n_head",))
def decoder_forward(x, context, params, n_head):
    for p in params:
        x = decoder_block(x, context, p, n_head)
    return x


# ----------------------------------------------------------------------------
# Deterministic parameter init (PyTorch nn.Linear-style uniform)
# ----------------------------------------------------------------------------

def _init_linear(key, din, dout):
    kw, kb = jax.random.split(key)
    bound = 1.0 / math.sqrt(din)
    w = jax.random.uniform(kw, (din, dout), jnp.float32, -bound, bound)
    b = jax.random.uniform(kb, (dout,), jnp.float32, -bound, bound)
    return w, b


def _init_self_attn(key, d_model):
    ks = jax.random.split(key, 4)
    wq, bq = _init_linear(ks[0], d_model, d_model)
    wk, bk = _init_linear(ks[1], d_model, d_model)
    wv, bv = _init_linear(ks[2], d_model, d_model)
    wo, bo = _init_linear(ks[3], d_model, d_model)
    return dict(wqkv=jnp.concatenate([wq, wk, wv], axis=1),
                bqkv=jnp.concatenate([bq, bk, bv], axis=0),
                wo=wo, bo=bo)


def _init_cross_attn(key, d_model):
    ks = jax.random.split(key, 4)
    wq, bq = _init_linear(ks[0], d_model, d_model)
    wk, bk = _init_linear(ks[1], d_model, d_model)
    wv, bv = _init_linear(ks[2], d_model, d_model)
    wo, bo = _init_linear(ks[3], d_model, d_model)
    return dict(wq=wq, bq=bq,
                wkv=jnp.concatenate([wk, wv], axis=1),
                bkv=jnp.concatenate([bk, bv], axis=0),
                wo=wo, bo=bo)


def init_decoder_params(key, d_model, fc_hidden, n_layer):
    params = []
    for lk in jax.random.split(key, n_layer):
        k1, k2, k3, k4 = jax.random.split(lk, 4)
        w1, b1 = _init_linear(k3, d_model, fc_hidden)
        w2, b2 = _init_linear(k4, fc_hidden, d_model)
        params.append(dict(
            self_attn=_init_self_attn(k1, d_model),
            cross_attn=_init_cross_attn(k2, d_model),
            w1=w1, b1=b1, w2=w2, b2=b2,
            ln1_g=jnp.ones((d_model,), jnp.float32),
            ln1_b=jnp.zeros((d_model,), jnp.float32),
            ln2_g=jnp.ones((d_model,), jnp.float32),
            ln2_b=jnp.zeros((d_model,), jnp.float32),
            ln3_g=jnp.ones((d_model,), jnp.float32),
            ln3_b=jnp.zeros((d_model,), jnp.float32),
        ))
    return params


if __name__ == "__main__":
    B, S_dec, S_enc = 2, 8, 8
    d_model, n_head, fc_hidden, n_layer = 32, 4, 64, 2

    root = jax.random.PRNGKey(0)
    kx, kc, kp = jax.random.split(root, 3)
    x = jax.random.normal(kx, (B, S_dec, d_model), jnp.float32)
    context = jax.random.normal(kc, (B, S_enc, d_model), jnp.float32)
    params = init_decoder_params(kp, d_model, fc_hidden, n_layer)

    out = decoder_forward(x, context, params, n_head)
    out = jax.block_until_ready(out)

    assert out.shape == (B, S_dec, d_model), out.shape
    assert bool(jnp.all(jnp.isfinite(out))), "non-finite output"
    print("KERNEL_OK")
</pallas_src>

<mosaic_0001>
module attributes {stable_mosaic.version = 11 : i64} {
  func.func @_matmul_bias_kernel(%arg0: i32, %arg1: i32, %arg2: i32, %arg3: memref<16x32xf32, #tpu.memory_space<vmem>>, %arg4: memref<32x96xf32, #tpu.memory_space<vmem>>, %arg5: memref<1x96xf32, #tpu.memory_space<vmem>>, %arg6: memref<16x96xf32, #tpu.memory_space<vmem>>, %arg7: memref<16x96xf32, #tpu.memory_space<vmem>>) attributes {dimension_semantics = [#tpu.dimension_semantics<parallel>, #tpu.dimension_semantics<parallel>, #tpu.dimension_semantics<arbitrary>], iteration_bounds = array<i64: 1, 1, 1>, scalar_prefetch = 0 : i64, scratch_operands = 1 : i64, tpu.core_type = #tpu.core_type<tc>, window_params = [{transform_indices = @transform_0, window_bounds = array<i64: 16, 32>}, {transform_indices = @transform_1, window_bounds = array<i64: 32, 96>}, {transform_indices = @transform_2, window_bounds = array<i64: 1, 96>}, {transform_indices = @transform_3, window_bounds = array<i64: 16, 96>}]} {
    %c0_i32 = arith.constant 0 : i32
    %0 = arith.cmpi eq, %arg2, %c0_i32 : i32
    %1 = arith.extui %0 : i1 to i32
    %c0_i32_0 = arith.constant 0 : i32
    %2 = arith.cmpi ne, %1, %c0_i32_0 : i32
    scf.if %2 {
      %cst_10 = arith.constant 0.000000e+00 : f32
      %12 = vector.broadcast %cst_10 : f32 to vector<16x96xf32>
      %c0_11 = arith.constant 0 : index
      %c0_12 = arith.constant 0 : index
      %13 = vector.load %arg7[%c0_11, %c0_12] : memref<16x96xf32, #tpu.memory_space<vmem>>, vector<16x96xf32>
      tpu.vector_store %arg7[%c0_11, %c0_12], %12 {strides = array<i32>} : memref<16x96xf32, #tpu.memory_space<vmem>>, vector<16x96xf32>,
    } else {
    }
    %c0 = arith.constant 0 : index
    %c0_1 = arith.constant 0 : index
    %3 = vector.load %arg7[%c0, %c0_1] : memref<16x96xf32, #tpu.memory_space<vmem>>, vector<16x96xf32>
    %c0_2 = arith.constant 0 : index
    %c0_3 = arith.constant 0 : index
    %4 = vector.load %arg3[%c0_2, %c0_3] : memref<16x32xf32, #tpu.memory_space<vmem>>, vector<16x32xf32>
    %c0_4 = arith.constant 0 : index
    %c0_5 = arith.constant 0 : index
    %5 = vector.load %arg4[%c0_4, %c0_5] : memref<32x96xf32, #tpu.memory_space<vmem>>, vector<32x96xf32>
    %cst = arith.constant dense<0.000000e+00> : vector<16x96xf32>
    %6 = tpu.matmul %4, %5, %cst {dimension_numbers = #tpu.dot_dimension_numbers<[1], [0], [0], [1], [0, 0, 1, 1], [], []>} : vector<16x32xf32>, vector<32x96xf32>, vector<16x96xf32> -> vector<16x96xf32>
    %7 = arith.addf %3, %6 : vector<16x96xf32>
    %c0_6 = arith.constant 0 : index
    %c0_7 = arith.constant 0 : index
    %8 = vector.load %arg7[%c0_6, %c0_7] : memref<16x96xf32, #tpu.memory_space<vmem>>, vector<16x96xf32>
    tpu.vector_store %arg7[%c0_6, %c0_7], %7 {strides = array<i32>} : memref<16x96xf32, #tpu.memory_space<vmem>>, vector<16x96xf32>,
    %c0_i32_8 = arith.constant 0 : i32
    %9 = arith.cmpi eq, %arg2, %c0_i32_8 : i32
    %10 = arith.extui %9 : i1 to i32
    %c0_i32_9 = arith.constant 0 : i32
    %11 = arith.cmpi ne, %10, %c0_i32_9 : i32
    scf.if %11 {
      %c0_10 = arith.constant 0 : index
      %c0_11 = arith.constant 0 : index
      %12 = vector.load %arg7[%c0_10, %c0_11] : memref<16x96xf32, #tpu.memory_space<vmem>>, vector<16x96xf32>
      %c0_12 = arith.constant 0 : index
      %c0_13 = arith.constant 0 : index
      %13 = vector.load %arg5[%c0_12, %c0_13] : memref<1x96xf32, #tpu.memory_space<vmem>>, vector<1x96xf32>
      %14 = vector.broadcast %13 : vector<1x96xf32> to vector<16x96xf32>
      %15 = arith.addf %12, %14 : vector<16x96xf32>
      %c0_14 = arith.constant 0 : index
      %c0_15 = arith.constant 0 : index
      %16 = vector.load %arg6[%c0_14, %c0_15] : memref<16x96xf32, #tpu.memory_space<vmem>>, vector<16x96xf32>
      tpu.vector_store %arg6[%c0_14, %c0_15], %15 {strides = array<i32>} : memref<16x96xf32, #tpu.memory_space<vmem>>, vector<16x96xf32>,
    } else {
    }
    return
  }
  func.func @transform_0(%arg0: i32, %arg1: i32, %arg2: i32) -> (i32, i32) {
    %c0_i32 = arith.constant 0 : i32
    return %arg0, %arg2 : i32, i32
  }
  func.func @transform_1(%arg0: i32, %arg1: i32, %arg2: i32) -> (i32, i32) {
    %c0_i32 = arith.constant 0 : i32
    return %arg2, %arg1 : i32, i32
  }
  func.func @transform_2(%arg0: i32, %arg1: i32, %arg2: i32) -> (i32, i32) {
    %c0_i32 = arith.constant 0 : i32
    %c0_i32_0 = arith.constant 0 : i32
    return %c0_i32, %arg1 : i32, i32
  }
  func.func @transform_3(%arg0: i32, %arg1: i32, %arg2: i32) -> (i32, i32) {
    %c0_i32 = arith.constant 0 : i32
    return %arg0, %arg1 : i32, i32
  }
}

module attributes {stable_mosaic.version = 11 : i64} {
  func.func @_flash_attn_kernel(%arg0: i32, %arg1: i32, %arg2: i32, %arg3: memref<1x4x8x8xf32, #tpu.memory_space<vmem>>, %arg4: memref<1x4x8x8xf32, #tpu.memory_space<vmem>>, %arg5: memref<1x4x8x8xf32, #tpu.memory_space<vmem>>, %arg6: memref<1x4x8x8xf32, #tpu.memory_space<vmem>>, %arg7: memref<4x8x1xf32, #tpu.memory_space<vmem>>, %arg8: memref<4x8x1xf32, #tpu.memory_space<vmem>>, %arg9: memref<4x8x8xf32, #tpu.memory_space<vmem>>) attributes {dimension_semantics = [#tpu.dimension_semantics<parallel>, #tpu.dimension_semantics<parallel>, #tpu.dimension_semantics<arbitrary>], iteration_bounds = array<i64: 2, 1, 1>, scalar_prefetch = 0 : i64, scratch_operands = 3 : i64, tpu.core_type = #tpu.core_type<tc>, window_params = [{transform_indices = @transform_0, window_bounds = array<i64: 1, 4, 8, 8>}, {transform_indices = @transform_1, window_bounds = array<i64: 1, 4, 8, 8>}, {transform_indices = @transform_2, window_bounds = array<i64: 1, 4, 8, 8>}, {transform_indices = @transform_3, window_bounds = array<i64: 1, 4, 8, 8>}]} {
    %c0_i32 = arith.constant 0 : i32
    %0 = arith.cmpi eq, %arg2, %c0_i32 : i32
    %1 = arith.extui %0 : i1 to i32
    %c0_i32_0 = arith.constant 0 : i32
    %2 = arith.cmpi ne, %1, %c0_i32_0 : i32
    scf.if %2 {
      %cst_36 = arith.constant 0xFF800000 : f32
      %37 = vector.broadcast %cst_36 : f32 to vector<4x8x1xf32>
      %c0_37 = arith.constant 0 : index
      %c0_38 = arith.constant 0 : index
      %c0_39 = arith.constant 0 : index
      %38 = vector.load %arg7[%c0_37, %c0_38, %c0_39] : memref<4x8x1xf32, #tpu.memory_space<vmem>>, vector<4x8x1xf32>
      tpu.vector_store %arg7[%c0_37, %c0_38, %c0_39], %37 {strides = array<i32>} : memref<4x8x1xf32, #tpu.memory_space<vmem>>, vector<4x8x1xf32>,
      %cst_40 = arith.constant 0.000000e+00 : f32
      %39 = vector.broadcast %cst_40 : f32 to vector<4x8x1xf32>
      %c0_41 = arith.constant 0 : index
      %c0_42 = arith.constant 0 : index
      %c0_43 = arith.constant 0 : index
      %40 = vector.load %arg8[%c0_41, %c0_42, %c0_43] : memref<4x8x1xf32, #tpu.memory_space<vmem>>, vector<4x8x1xf32>
      tpu.vector_store %arg8[%c0_41, %c0_42, %c0_43], %39 {strides = array<i32>} : memref<4x8x1xf32, #tpu.memory_space<vmem>>, vector<4x8x1xf32>,
      %cst_44 = arith.constant 0.000000e+00 : f32
      %41 = vector.broadcast %cst_44 : f32 to vector<4x8x8xf32>
      %c0_45 = arith.constant 0 : index
      %c0_46 = arith.constant 0 : index
      %c0_47 = arith.constant 0 : index
      %42 = vector.load %arg9[%c0_45, %c0_46, %c0_47] : memref<4x8x8xf32, #tpu.memory_space<vmem>>, vector<4x8x8xf32>
      tpu.vector_store %arg9[%c0_45, %c0_46, %c0_47], %41 {strides = array<i32>} : memref<4x8x8xf32, #tpu.memory_space<vmem>>, vector<4x8x8xf32>,
    } else {
    }
    %c0 = arith.constant 0 : index
    %c0_1 = arith.constant 0 : index
    %c0_2 = arith.constant 0 : index
    %c0_3 = arith.constant 0 : index
    %3 = vector.load %arg3[%c0, %c0_1, %c0_2, %c0_3] : memref<1x4x8x8xf32, #tpu.memory_space<vmem>>, vector<1x4x8x8xf32>
    %4 = vector.shape_cast %3 : vector<1x4x8x8xf32> to vector<4x8x8xf32>
    %c0_4 = arith.constant 0 : index
    %c0_5 = arith.constant 0 : index
    %c0_6 = arith.constant 0 : index
    %c0_7 = arith.constant 0 : index
    %5 = vector.load %arg4[%c0_4, %c0_5, %c0_6, %c0_7] : memref<1x4x8x8xf32, #tpu.memory_space<vmem>>, vector<1x4x8x8xf32>
    %6 = vector.shape_cast %5 : vector<1x4x8x8xf32> to vector<4x8x8xf32>
    %c0_8 = arith.constant 0 : index
    %c0_9 = arith.constant 0 : index
    %c0_10 = arith.constant 0 : index
    %c0_11 = arith.constant 0 : index
    %7 = vector.load %arg5[%c0_8, %c0_9, %c0_10, %c0_11] : memref<1x4x8x8xf32, #tpu.memory_space<vmem>>, vector<1x4x8x8xf32>
    %8 = vector.shape_cast %7 : vector<1x4x8x8xf32> to vector<4x8x8xf32>
    "tpu.trace_start"() <{level = 10 : i32, message = "hqd,hkd->hqk"}> : () -> ()
    %cst = arith.constant dense<0.000000e+00> : vector<4x8x8xf32>
    %9 = tpu.matmul %4, %6, %cst {dimension_numbers = #tpu.dot_dimension_numbers<[2], [2], [1], [1], [0, 0, 0, 1, 1, 1], [0], [0]>} : vector<4x8x8xf32>, vector<4x8x8xf32>, vector<4x8x8xf32> -> vector<4x8x8xf32>
    "tpu.trace_stop"() : () -> ()
    %cst_12 = arith.constant 0.353553385 : f32
    %10 = vector.broadcast %cst_12 : f32 to vector<4x8x8xf32>
    %11 = arith.mulf %9, %10 : vector<4x8x8xf32>
    %c0_13 = arith.constant 0 : index
    %c0_14 = arith.constant 0 : index
    %c0_15 = arith.constant 0 : index
    %12 = vector.load %arg7[%c0_13, %c0_14, %c0_15] : memref<4x8x1xf32, #tpu.memory_space<vmem>>, vector<4x8x1xf32>
    %cst_16 = arith.constant dense<0xFF800000> : vector<4x8xf32>
    %13 = vector.multi_reduction <maximumf>, %11, %cst_16 [2] : vector<4x8x8xf32> to vector<4x8xf32>
    %14 = vector.shape_cast %13 : vector<4x8xf32> to vector<4x8x1xf32>
    %15 = arith.maximumf %12, %14 : vector<4x8x1xf32>
    %16 = arith.subf %12, %15 : vector<4x8x1xf32>
    %17 = math.exp %16 : vector<4x8x1xf32>
    %18 = vector.broadcast %15 : vector<4x8x1xf32> to vector<4x8x8xf32>
    %19 = arith.subf %11, %18 : vector<4x8x8xf32>
    %20 = math.exp %19 : vector<4x8x8xf32>
    %c0_17 = arith.constant 0 : index
    %c0_18 = arith.constant 0 : index
    %c0_19 = arith.constant 0 : index
    %21 = vector.load %arg8[%c0_17, %c0_18, %c0_19] : memref<4x8x1xf32, #tpu.memory_space<vmem>>, vector<4x8x1xf32>
    %22 = arith.mulf %17, %21 : vector<4x8x1xf32>
    %cst_20 = arith.constant dense<0.000000e+00> : vector<4x8xf32>
    %23 = vector.multi_reduction <add>, %20, %cst_20 [2] : vector<4x8x8xf32> to vector<4x8xf32>
    %24 = vector.shape_cast %23 : vector<4x8xf32> to vector<4x8x1xf32>
    %25 = arith.addf %22, %24 : vector<4x8x1xf32>
    %c0_21 = arith.constant 0 : index
    %c0_22 = arith.constant 0 : index
    %c0_23 = arith.constant 0 : index
    %26 = vector.load %arg8[%c0_21, %c0_22, %c0_23] : memref<4x8x1xf32, #tpu.memory_space<vmem>>, vector<4x8x1xf32>
    tpu.vector_store %arg8[%c0_21, %c0_22, %c0_23], %25 {strides = array<i32>} : memref<4x8x1xf32, #tpu.memory_space<vmem>>, vector<4x8x1xf32>,
    %c0_24 = arith.constant 0 : index
    %c0_25 = arith.constant 0 : index
    %c0_26 = arith.constant 0 : index
    %27 = vector.load %arg9[%c0_24, %c0_25, %c0_26] : memref<4x8x8xf32, #tpu.memory_space<vmem>>, vector<4x8x8xf32>
    %28 = vector.broadcast %17 : vector<4x8x1xf32> to vector<4x8x8xf32>
    %29 = arith.mulf %28, %27 : vector<4x8x8xf32>
    "tpu.trace_start"() <{level = 10 : i32, message = "hqk,hkd->hqd"}> : () -> ()
    %cst_27 = arith.constant dense<0.000000e+00> : vector<4x8x8xf32>
    %30 = tpu.matmul %20, %8, %cst_27 {dimension_numbers = #tpu.dot_dimension_numbers<[2], [1], [1], [2], [0, 0, 0, 1, 1, 2], [0], [0]>} : vector<4x8x8xf32>, vector<4x8x8xf32>, vector<4x8x8xf32> -> vector<4x8x8xf32>
    "tpu.trace_stop"() : () -> ()
    %31 = arith.addf %29, %30 : vector<4x8x8xf32>
    %c0_28 = arith.constant 0 : index
    %c0_29 = arith.constant 0 : index
    %c0_30 = arith.constant 0 : index
    %32 = vector.load %arg9[%c0_28, %c0_29, %c0_30] : memref<4x8x8xf32, #tpu.memory_space<vmem>>, vector<4x8x8xf32>
    tpu.vector_store %arg9[%c0_28, %c0_29, %c0_30], %31 {strides = array<i32>} : memref<4x8x8xf32, #tpu.memory_space<vmem>>, vector<4x8x8xf32>,
    %c0_31 = arith.constant 0 : index
    %c0_32 = arith.constant 0 : index
    %c0_33 = arith.constant 0 : index
    %33 = vector.load %arg7[%c0_31, %c0_32, %c0_33] : memref<4x8x1xf32, #tpu.memory_space<vmem>>, vector<4x8x1xf32>
    tpu.vector_store %arg7[%c0_31, %c0_32, %c0_33], %15 {strides = array<i32>} : memref<4x8x1xf32, #tpu.memory_space<vmem>>, vector<4x8x1xf32>,
    %c0_i32_34 = arith.constant 0 : i32
    %34 = arith.cmpi eq, %arg2, %c0_i32_34 : i32
    %35 = arith.extui %34 : i1 to i32
    %c0_i32_35 = arith.constant 0 : i32
    %36 = arith.cmpi ne, %35, %c0_i32_35 : i32
    scf.if %36 {
      %c0_36 = arith.constant 0 : index
      %c0_37 = arith.constant 0 : index
      %c0_38 = arith.constant 0 : index
      %37 = vector.load %arg9[%c0_36, %c0_37, %c0_38] : memref<4x8x8xf32, #tpu.memory_space<vmem>>, vector<4x8x8xf32>
      %c0_39 = arith.constant 0 : index
      %c0_40 = arith.constant 0 : index
      %c0_41 = arith.constant 0 : index
      %38 = vector.load %arg8[%c0_39, %c0_40, %c0_41] : memref<4x8x1xf32, #tpu.memory_space<vmem>>, vector<4x8x1xf32>
      %39 = tpu.reciprocal %38 {approx = true} : vector<4x8x1xf32> -> vector<4x8x1xf32>
      %40 = vector.broadcast %39 : vector<4x8x1xf32> to vector<4x8x8xf32>
      %41 = arith.mulf %37, %40 : vector<4x8x8xf32>
      %c0_42 = arith.constant 0 : index
      %c0_43 = arith.constant 0 : index
      %c0_44 = arith.constant 0 : index
      %c0_45 = arith.constant 0 : index
      %42 = vector.load %arg6[%c0_42, %c0_43, %c0_44, %c0_45] : memref<1x4x8x8xf32, #tpu.memory_space<vmem>>, vector<1x4x8x8xf32>
      %43 = vector.shape_cast %42 : vector<1x4x8x8xf32> to vector<4x8x8xf32>
      %44 = vector.shape_cast %41 : vector<4x8x8xf32> to vector<1x4x8x8xf32>
      tpu.vector_store %arg6[%c0_42, %c0_43, %c0_44, %c0_45], %44 {strides = array<i32>} : memref<1x4x8x8xf32, #tpu.memory_space<vmem>>, vector<1x4x8x8xf32>,
    } else {
    }
    return
  }
  func.func @transform_0(%arg0: i32, %arg1: i32, %arg2: i32) -> (i32, i32, i32, i32) {
    %c0_i32 = arith.constant 0 : i32
    %c0_i32_0 = arith.constant 0 : i32
    %c0_i32_1 = arith.constant 0 : i32
    return %arg0, %c0_i32, %arg1, %c0_i32_0 : i32, i32, i32, i32
  }
  func.func @transform_1(%arg0: i32, %arg1: i32, %arg2: i32) -> (i32, i32, i32, i32) {
    %c0_i32 = arith.constant 0 : i32
    %c0_i32_0 = arith.constant 0 : i32
    %c0_i32_1 = arith.constant 0 : i32
    return %arg0, %c0_i32, %arg2, %c0_i32_0 : i32, i32, i32, i32
  }
  func.func @transform_2(%arg0: i32, %arg1: i32, %arg2: i32) -> (i32, i32, i32, i32) {
    %c0_i32 = arith.constant 0 : i32
    %c0_i32_0 = arith.constant 0 : i32
    %c0_i32_1 = arith.constant 0 : i32
    return %arg0, %c0_i32, %arg2, %c0_i32_0 : i32, i32, i32, i32
  }
  func.func @transform_3(%arg0: i32, %arg1: i32, %arg2: i32) -> (i32, i32, i32, i32) {
    %c0_i32 = arith.constant 0 : i32
    %c0_i32_0 = arith.constant 0 : i32
    %c0_i32_1 = arith.constant 0 : i32
    return %arg0, %c0_i32, %arg1, %c0_i32_0 : i32, i32, i32, i32
  }
}

module attributes {stable_mosaic.version = 11 : i64} {
  func.func @_matmul_bias_kernel(%arg0: i32, %arg1: i32, %arg2: i32, %arg3: memref<16x32xf32, #tpu.memory_space<vmem>>, %arg4: memref<32x32xf32, #tpu.memory_space<vmem>>, %arg5: memref<1x32xf32, #tpu.memory_space<vmem>>, %arg6: memref<16x32xf32, #tpu.memory_space<vmem>>, %arg7: memref<16x32xf32, #tpu.memory_space<vmem>>) attributes {dimension_semantics = [#tpu.dimension_semantics<parallel>, #tpu.dimension_semantics<parallel>, #tpu.dimension_semantics<arbitrary>], iteration_bounds = array<i64: 1, 1, 1>, scalar_prefetch = 0 : i64, scratch_operands = 1 : i64, tpu.core_type = #tpu.core_type<tc>, window_params = [{transform_indices = @transform_0, window_bounds = array<i64: 16, 32>}, {transform_indices = @transform_1, window_bounds = array<i64: 32, 32>}, {transform_indices = @transform_2, window_bounds = array<i64: 1, 32>}, {transform_indices = @transform_3, window_bounds = array<i64: 16, 32>}]} {
    %c0_i32 = arith.constant 0 : i32
    %0 = arith.cmpi eq, %arg2, %c0_i32 : i32
    %1 = arith.extui %0 : i1 to i32
    %c0_i32_0 = arith.constant 0 : i32
    %2 = arith.cmpi ne, %1, %c0_i32_0 : i32
    scf.if %2 {
      %cst_10 = arith.constant 0.000000e+00 : f32
      %12 = vector.broadcast %cst_10 : f32 to vector<16x32xf32>
      %c0_11 = arith.constant 0 : index
      %c0_12 = arith.constant 0 : index
      %13 = vector.load %arg7[%c0_11, %c0_12] : memref<16x32xf32, #tpu.memory_space<vmem>>, vector<16x32xf32>
      tpu.vector_store %arg7[%c0_11, %c0_12], %12 {strides = array<i32>} : memref<16x32xf32, #tpu.memory_space<vmem>>, vector<16x32xf32>,
    } else {
    }
    %c0 = arith.constant 0 : index
    %c0_1 = arith.constant 0 : index
    %3 = vector.load %arg7[%c0, %c0_1] : memref<16x32xf32, #tpu.memory_space<vmem>>, vector<16x32xf32>
    %c0_2 = arith.constant 0 : index
    %c0_3 = arith.constant 0 : index
    %4 = vector.load %arg3[%c0_2, %c0_3] : memref<16x32xf32, #tpu.memory_space<vmem>>, vector<16x32xf32>
    %c0_4 = arith.constant 0 : index
    %c0_5 = arith.constant 0 : index
    %5 = vector.load %arg4[%c0_4, %c0_5] : memref<32x32xf32, #tpu.memory_space<vmem>>, vector<32x32xf32>
    %cst = arith.constant dense<0.000000e+00> : vector<16x32xf32>
    %6 = tpu.matmul %4, %5, %cst {dimension_numbers = #tpu.dot_dimension_numbers<[1], [0], [0], [1], [0, 0, 1, 1], [], []>} : vector<16x32xf32>, vector<32x32xf32>, vector<16x32xf32> -> vector<16x32xf32>
    %7 = arith.addf %3, %6 : vector<16x32xf32>
    %c0_6 = arith.constant 0 : index
    %c0_7 = arith.constant 0 : index
    %8 = vector.load %arg7[%c0_6, %c0_7] : memref<16x32xf32, #tpu.memory_space<vmem>>, vector<16x32xf32>
    tpu.vector_store %arg7[%c0_6, %c0_7], %7 {strides = array<i32>} : memref<16x32xf32, #tpu.memory_space<vmem>>, vector<16x32xf32>,
    %c0_i32_8 = arith.constant 0 : i32
    %9 = arith.cmpi eq, %arg2, %c0_i32_8 : i32
    %10 = arith.extui %9 : i1 to i32
    %c0_i32_9 = arith.constant 0 : i32
    %11 = arith.cmpi ne, %10, %c0_i32_9 : i32
    scf.if %11 {
      %c0_10 = arith.constant 0 : index
      %c0_11 = arith.constant 0 : index
      %12 = vector.load %arg7[%c0_10, %c0_11] : memref<16x32xf32, #tpu.memory_space<vmem>>, vector<16x32xf32>
      %c0_12 = arith.constant 0 : index
      %c0_13 = arith.constant 0 : index
      %13 = vector.load %arg5[%c0_12, %c0_13] : memref<1x32xf32, #tpu.memory_space<vmem>>, vector<1x32xf32>
      %14 = vector.broadcast %13 : vector<1x32xf32> to vector<16x32xf32>
      %15 = arith.addf %12, %14 : vector<16x32xf32>
      %c0_14 = arith.constant 0 : index
      %c0_15 = arith.constant 0 : index
      %16 = vector.load %arg6[%c0_14, %c0_15] : memref<16x32xf32, #tpu.memory_space<vmem>>, vector<16x32xf32>
      tpu.vector_store %arg6[%c0_14, %c0_15], %15 {strides = array<i32>} : memref<16x32xf32, #tpu.memory_space<vmem>>, vector<16x32xf32>,
    } else {
    }
    return
  }
  func.func @transform_0(%arg0: i32, %arg1: i32, %arg2: i32) -> (i32, i32) {
    %c0_i32 = arith.constant 0 : i32
    return %arg0, %arg2 : i32, i32
  }
  func.func @transform_1(%arg0: i32, %arg1: i32, %arg2: i32) -> (i32, i32) {
    %c0_i32 = arith.constant 0 : i32
    return %arg2, %arg1 : i32, i32
  }
  func.func @transform_2(%arg0: i32, %arg1: i32, %arg2: i32) -> (i32, i32) {
    %c0_i32 = arith.constant 0 : i32
    %c0_i32_0 = arith.constant 0 : i32
    return %c0_i32, %arg1 : i32, i32
  }
  func.func @transform_3(%arg0: i32, %arg1: i32, %arg2: i32) -> (i32, i32) {
    %c0_i32 = arith.constant 0 : i32
    return %arg0, %arg1 : i32, i32
  }
}

module attributes {stable_mosaic.version = 11 : i64} {
  func.func @_matmul_residual_ln_kernel(%arg0: i32, %arg1: i32, %arg2: memref<16x32xf32, #tpu.memory_space<vmem>>, %arg3: memref<32x32xf32, #tpu.memory_space<vmem>>, %arg4: memref<1x32xf32, #tpu.memory_space<vmem>>, %arg5: memref<16x32xf32, #tpu.memory_space<vmem>>, %arg6: memref<1x32xf32, #tpu.memory_space<vmem>>, %arg7: memref<1x32xf32, #tpu.memory_space<vmem>>, %arg8: memref<16x32xf32, #tpu.memory_space<vmem>>, %arg9: memref<16x32xf32, #tpu.memory_space<vmem>>) attributes {dimension_semantics = [#tpu.dimension_semantics<parallel>, #tpu.dimension_semantics<arbitrary>], iteration_bounds = array<i64: 1, 1>, scalar_prefetch = 0 : i64, scratch_operands = 1 : i64, tpu.core_type = #tpu.core_type<tc>, window_params = [{transform_indices = @transform_0, window_bounds = array<i64: 16, 32>}, {transform_indices = @transform_1, window_bounds = array<i64: 32, 32>}, {pipeline_mode = #tpu.pipeline_mode<synchronous>, transform_indices = @transform_2, window_bounds = array<i64: 1, 32>}, {transform_indices = @transform_3, window_bounds = array<i64: 16, 32>}, {pipeline_mode = #tpu.pipeline_mode<synchronous>, transform_indices = @transform_4, window_bounds = array<i64: 1, 32>}, {pipeline_mode = #tpu.pipeline_mode<synchronous>, transform_indices = @transform_5, window_bounds = array<i64: 1, 32>}, {transform_indices = @transform_6, window_bounds = array<i64: 16, 32>}]} {
    %c0_i32 = arith.constant 0 : i32
    %0 = arith.cmpi eq, %arg1, %c0_i32 : i32
    %1 = arith.extui %0 : i1 to i32
    %c0_i32_0 = arith.constant 0 : i32
    %2 = arith.cmpi ne, %1, %c0_i32_0 : i32
    scf.if %2 {
      %cst_10 = arith.constant 0.000000e+00 : f32
      %12 = vector.broadcast %cst_10 : f32 to vector<16x32xf32>
      %c0_11 = arith.constant 0 : index
      %c0_12 = arith.constant 0 : index
      %13 = vector.load %arg9[%c0_11, %c0_12] : memref<16x32xf32, #tpu.memory_space<vmem>>, vector<16x32xf32>
      tpu.vector_store %arg9[%c0_11, %c0_12], %12 {strides = array<i32>} : memref<16x32xf32, #tpu.memory_space<vmem>>, vector<16x32xf32>,
    } else {
    }
    %c0 = arith.constant 0 : index
    %c0_1 = arith.constant 0 : index
    %3 = vector.load %arg9[%c0, %c0_1] : memref<16x32xf32, #tpu.memory_space<vmem>>, vector<16x32xf32>
    %c0_2 = arith.constant 0 : index
    %c0_3 = arith.constant 0 : index
    %4 = vector.load %arg2[%c0_2, %c0_3] : memref<16x32xf32, #tpu.memory_space<vmem>>, vector<16x32xf32>
    %c0_4 = arith.constant 0 : index
    %c0_5 = arith.constant 0 : index
    %5 = vector.load %arg3[%c0_4, %c0_5] : memref<32x32xf32, #tpu.memory_space<vmem>>, vector<32x32xf32>
    %cst = arith.constant dense<0.000000e+00> : vector<16x32xf32>
    %6 = tpu.matmul %4, %5, %cst {dimension_numbers = #tpu.dot_dimension_numbers<[1], [0], [0], [1], [0, 0, 1, 1], [], []>} : vector<16x32xf32>, vector<32x32xf32>, vector<16x32xf32> -> vector<16x32xf32>
    %7 = arith.addf %3, %6 : vector<16x32xf32>
    %c0_6 = arith.constant 0 : index
    %c0_7 = arith.constant 0 : index
    %8 = vector.load %arg9[%c0_6, %c0_7] : memref<16x32xf32, #tpu.memory_space<vmem>>, vector<16x32xf32>
    tpu.vector_store %arg9[%c0_6, %c0_7], %7 {strides = array<i32>} : memref<16x32xf32, #tpu.memory_space<vmem>>, vector<16x32xf32>,
    %c0_i32_8 = arith.constant 0 : i32
    %9 = arith.cmpi eq, %arg1, %c0_i32_8 : i32
    %10 = arith.extui %9 : i1 to i32
    %c0_i32_9 = arith.constant 0 : i32
    %11 = arith.cmpi ne, %10, %c0_i32_9 : i32
    scf.if %11 {
      %c0_10 = arith.constant 0 : index
      %c0_11 = arith.constant 0 : index
      %12 = vector.load %arg9[%c0_10, %c0_11] : memref<16x32xf32, #tpu.memory_space<vmem>>, vector<16x32xf32>
      %c0_12 = arith.constant 0 : index
      %c0_13 = arith.constant 0 : index
      %13 = vector.load %arg4[%c0_12, %c0_13] : memref<1x32xf32, #tpu.memory_space<vmem>>, vector<1x32xf32>
      %14 = vector.broadcast %13 : vector<1x32xf32> to vector<16x32xf32>
      %15 = arith.addf %12, %14 : vector<16x32xf32>
      %c0_14 = arith.constant 0 : index
      %c0_15 = arith.constant 0 : index
      %16 = vector.load %arg5[%c0_14, %c0_15] : memref<16x32xf32, #tpu.memory_space<vmem>>, vector<16x32xf32>
      %17 = arith.addf %15, %16 : vector<16x32xf32>
      %cst_16 = arith.constant dense<0.000000e+00> : vector<16xf32>
      %18 = vector.multi_reduction <add>, %17, %cst_16 [1] : vector<16x32xf32> to vector<16xf32>
      %19 = vector.shape_cast %18 : vector<16xf32> to vector<16x1xf32>
      %cst_17 = arith.constant 3.200000e+01 : f32
      %20 = vector.broadcast %cst_17 : f32 to vector<16x1xf32>
      %21 = arith.divf %19, %20 : vector<16x1xf32>
      %22 = vector.broadcast %21 : vector<16x1xf32> to vector<16x32xf32>
      %23 = arith.subf %17, %22 : vector<16x32xf32>
      %24 = arith.mulf %23, %23 : vector<16x32xf32>
      %cst_18 = arith.constant dense<0.000000e+00> : vector<16xf32>
      %25 = vector.multi_reduction <add>, %24, %cst_18 [1] : vector<16x32xf32> to vector<16xf32>
      %26 = vector.shape_cast %25 : vector<16xf32> to vector<16x1xf32>
      %cst_19 = arith.constant 3.200000e+01 : f32
      %27 = vector.broadcast %cst_19 : f32 to vector<16x1xf32>
      %28 = arith.divf %26, %27 : vector<16x1xf32>
      %29 = vector.broadcast %21 : vector<16x1xf32> to vector<16x32xf32>
      %30 = arith.subf %17, %29 : vector<16x32xf32>
      %cst_20 = arith.constant 9.99999974E-6 : f32
      %31 = vector.broadcast %cst_20 : f32 to vector<16x1xf32>
      %32 = arith.addf %28, %31 : vector<16x1xf32>
      %33 = math.rsqrt %32 : vector<16x1xf32>
      %34 = vector.broadcast %33 : vector<16x1xf32> to vector<16x32xf32>
      %35 = arith.mulf %30, %34 : vector<16x32xf32>
      %c0_21 = arith.constant 0 : index
      %c0_22 = arith.constant 0 : index
      %36 = vector.load %arg6[%c0_21, %c0_22] : memref<1x32xf32, #tpu.memory_space<vmem>>, vector<1x32xf32>
      %37 = vector.broadcast %36 : vector<1x32xf32> to vector<16x32xf32>
      %38 = arith.mulf %35, %37 : vector<16x32xf32>
      %c0_23 = arith.constant 0 : index
      %c0_24 = arith.constant 0 : index
      %39 = vector.load %arg7[%c0_23, %c0_24] : memref<1x32xf32, #tpu.memory_space<vmem>>, vector<1x32xf32>
      %40 = vector.broadcast %39 : vector<1x32xf32> to vector<16x32xf32>
      %41 = arith.addf %38, %40 : vector<16x32xf32>
      %c0_25 = arith.constant 0 : index
      %c0_26 = arith.constant 0 : index
      %42 = vector.load %arg8[%c0_25, %c0_26] : memref<16x32xf32, #tpu.memory_space<vmem>>, vector<16x32xf32>
      tpu.vector_store %arg8[%c0_25, %c0_26], %41 {strides = array<i32>} : memref<16x32xf32, #tpu.memory_space<vmem>>, vector<16x32xf32>,
    } else {
    }
    return
  }
  func.func @transform_0(%arg0: i32, %arg1: i32) -> (i32, i32) {
    %c0_i32 = arith.constant 0 : i32
    return %arg0, %arg1 : i32, i32
  }
  func.func @transform_1(%arg0: i32, %arg1: i32) -> (i32, i32) {
    %c0_i32 = arith.constant 0 : i32
    %c0_i32_0 = arith.constant 0 : i32
    return %arg1, %c0_i32 : i32, i32
  }
  func.func @transform_2(%arg0: i32, %arg1: i32) -> (i32, i32) {
    %c0_i32 = arith.constant 0 : i32
    %c0_i32_0 = arith.constant 0 : i32
    %c0_i32_1 = arith.constant 0 : i32
    return %c0_i32, %c0_i32_0 : i32, i32
  }
  func.func @transform_3(%arg0: i32, %arg1: i32) -> (i32, i32) {
    %c0_i32 = arith.constant 0 : i32
    %c0_i32_0 = arith.constant 0 : i32
    return %arg0, %c0_i32 : i32, i32
  }
  func.func @transform_4(%arg0: i32, %arg1: i32) -> (i32, i32) {
    %c0_i32 = arith.constant 0 : i32
    %c0_i32_0 = arith.constant 0 : i32
    %c0_i32_1 = arith.constant 0 : i32
    return %c0_i32, %c0_i32_0 : i32, i32
  }
  func.func @transform_5(%arg0: i32, %arg1: i32) -> (i32, i32) {
    %c0_i32 = arith.constant 0 : i32
    %c0_i32_0 = arith.constant 0 : i32
    %c0_i32_1 = arith.constant 0 : i32
    return %c0_i32, %c0_i32_0 : i32, i32
  }
  func.func @transform_6(%arg0: i32, %arg1: i32) -> (i32, i32) {
    %c0_i32 = arith.constant 0 : i32
    %c0_i32_0 = arith.constant 0 : i32
    return %arg0, %c0_i32 : i32, i32
  }
}

module attributes {stable_mosaic.version = 11 : i64} {
  func.func @_matmul_bias_kernel(%arg0: i32, %arg1: i32, %arg2: i32, %arg3: memref<16x32xf32, #tpu.memory_space<vmem>>, %arg4: memref<32x64xf32, #tpu.memory_space<vmem>>, %arg5: memref<1x64xf32, #tpu.memory_space<vmem>>, %arg6: memref<16x64xf32, #tpu.memory_space<vmem>>, %arg7: memref<16x64xf32, #tpu.memory_space<vmem>>) attributes {dimension_semantics = [#tpu.dimension_semantics<parallel>, #tpu.dimension_semantics<parallel>, #tpu.dimension_semantics<arbitrary>], iteration_bounds = array<i64: 1, 1, 1>, scalar_prefetch = 0 : i64, scratch_operands = 1 : i64, tpu.core_type = #tpu.core_type<tc>, window_params = [{transform_indices = @transform_0, window_bounds = array<i64: 16, 32>}, {transform_indices = @transform_1, window_bounds = array<i64: 32, 64>}, {transform_indices = @transform_2, window_bounds = array<i64: 1, 64>}, {transform_indices = @transform_3, window_bounds = array<i64: 16, 64>}]} {
    %c0_i32 = arith.constant 0 : i32
    %0 = arith.cmpi eq, %arg2, %c0_i32 : i32
    %1 = arith.extui %0 : i1 to i32
    %c0_i32_0 = arith.constant 0 : i32
    %2 = arith.cmpi ne, %1, %c0_i32_0 : i32
    scf.if %2 {
      %cst_10 = arith.constant 0.000000e+00 : f32
      %12 = vector.broadcast %cst_10 : f32 to vector<16x64xf32>
      %c0_11 = arith.constant 0 : index
      %c0_12 = arith.constant 0 : index
      %13 = vector.load %arg7[%c0_11, %c0_12] : memref<16x64xf32, #tpu.memory_space<vmem>>, vector<16x64xf32>
      tpu.vector_store %arg7[%c0_11, %c0_12], %12 {strides = array<i32>} : memref<16x64xf32, #tpu.memory_space<vmem>>, vector<16x64xf32>,
    } else {
    }
    %c0 = arith.constant 0 : index
    %c0_1 = arith.constant 0 : index
    %3 = vector.load %arg7[%c0, %c0_1] : memref<16x64xf32, #tpu.memory_space<vmem>>, vector<16x64xf32>
    %c0_2 = arith.constant 0 : index
    %c0_3 = arith.constant 0 : index
    %4 = vector.load %arg3[%c0_2, %c0_3] : memref<16x32xf32, #tpu.memory_space<vmem>>, vector<16x32xf32>
    %c0_4 = arith.constant 0 : index
    %c0_5 = arith.constant 0 : index
    %5 = vector.load %arg4[%c0_4, %c0_5] : memref<32x64xf32, #tpu.memory_space<vmem>>, vector<32x64xf32>
    %cst = arith.constant dense<0.000000e+00> : vector<16x64xf32>
    %6 = tpu.matmul %4, %5, %cst {dimension_numbers = #tpu.dot_dimension_numbers<[1], [0], [0], [1], [0, 0, 1, 1], [], []>} : vector<16x32xf32>, vector<32x64xf32>, vector<16x64xf32> -> vector<16x64xf32>
    %7 = arith.addf %3, %6 : vector<16x64xf32>
    %c0_6 = arith.constant 0 : index
    %c0_7 = arith.constant 0 : index
    %8 = vector.load %arg7[%c0_6, %c0_7] : memref<16x64xf32, #tpu.memory_space<vmem>>, vector<16x64xf32>
    tpu.vector_store %arg7[%c0_6, %c0_7], %7 {strides = array<i32>} : memref<16x64xf32, #tpu.memory_space<vmem>>, vector<16x64xf32>,
    %c0_i32_8 = arith.constant 0 : i32
    %9 = arith.cmpi eq, %arg2, %c0_i32_8 : i32
    %10 = arith.extui %9 : i1 to i32
    %c0_i32_9 = arith.constant 0 : i32
    %11 = arith.cmpi ne, %10, %c0_i32_9 : i32
    scf.if %11 {
      %c0_10 = arith.constant 0 : index
      %c0_11 = arith.constant 0 : index
      %12 = vector.load %arg7[%c0_10, %c0_11] : memref<16x64xf32, #tpu.memory_space<vmem>>, vector<16x64xf32>
      %c0_12 = arith.constant 0 : index
      %c0_13 = arith.constant 0 : index
      %13 = vector.load %arg5[%c0_12, %c0_13] : memref<1x64xf32, #tpu.memory_space<vmem>>, vector<1x64xf32>
      %14 = vector.broadcast %13 : vector<1x64xf32> to vector<16x64xf32>
      %15 = arith.addf %12, %14 : vector<16x64xf32>
      %c0_14 = arith.constant 0 : index
      %c0_15 = arith.constant 0 : index
      %16 = vector.load %arg6[%c0_14, %c0_15] : memref<16x64xf32, #tpu.memory_space<vmem>>, vector<16x64xf32>
      tpu.vector_store %arg6[%c0_14, %c0_15], %15 {strides = array<i32>} : memref<16x64xf32, #tpu.memory_space<vmem>>, vector<16x64xf32>,
    } else {
    }
    return
  }
  func.func @transform_0(%arg0: i32, %arg1: i32, %arg2: i32) -> (i32, i32) {
    %c0_i32 = arith.constant 0 : i32
    return %arg0, %arg2 : i32, i32
  }
  func.func @transform_1(%arg0: i32, %arg1: i32, %arg2: i32) -> (i32, i32) {
    %c0_i32 = arith.constant 0 : i32
    return %arg2, %arg1 : i32, i32
  }
  func.func @transform_2(%arg0: i32, %arg1: i32, %arg2: i32) -> (i32, i32) {
    %c0_i32 = arith.constant 0 : i32
    %c0_i32_0 = arith.constant 0 : i32
    return %c0_i32, %arg1 : i32, i32
  }
  func.func @transform_3(%arg0: i32, %arg1: i32, %arg2: i32) -> (i32, i32) {
    %c0_i32 = arith.constant 0 : i32
    return %arg0, %arg1 : i32, i32
  }
}

module attributes {stable_mosaic.version = 11 : i64} {
  func.func @_ffn_residual_ln_kernel(%arg0: i32, %arg1: i32, %arg2: memref<16x32xf32, #tpu.memory_space<vmem>>, %arg3: memref<32x64xf32, #tpu.memory_space<vmem>>, %arg4: memref<1x64xf32, #tpu.memory_space<vmem>>, %arg5: memref<64x32xf32, #tpu.memory_space<vmem>>, %arg6: memref<1x32xf32, #tpu.memory_space<vmem>>, %arg7: memref<16x32xf32, #tpu.memory_space<vmem>>, %arg8: memref<1x32xf32, #tpu.memory_space<vmem>>, %arg9: memref<1x32xf32, #tpu.memory_space<vmem>>, %arg10: memref<16x32xf32, #tpu.memory_space<vmem>>, %arg11: memref<16x32xf32, #tpu.memory_space<vmem>>) attributes {dimension_semantics = [#tpu.dimension_semantics<parallel>, #tpu.dimension_semantics<arbitrary>], iteration_bounds = array<i64: 1, 1>, scalar_prefetch = 0 : i64, scratch_operands = 1 : i64, tpu.core_type = #tpu.core_type<tc>, window_params = [{transform_indices = @transform_0, window_bounds = array<i64: 16, 32>}, {transform_indices = @transform_1, window_bounds = array<i64: 32, 64>}, {transform_indices = @transform_2, window_bounds = array<i64: 1, 64>}, {transform_indices = @transform_3, window_bounds = array<i64: 64, 32>}, {pipeline_mode = #tpu.pipeline_mode<synchronous>, transform_indices = @transform_4, window_bounds = array<i64: 1, 32>}, {transform_indices = @transform_5, window_bounds = array<i64: 16, 32>}, {pipeline_mode = #tpu.pipeline_mode<synchronous>, transform_indices = @transform_6, window_bounds = array<i64: 1, 32>}, {pipeline_mode = #tpu.pipeline_mode<synchronous>, transform_indices = @transform_7, window_bounds = array<i64: 1, 32>}, {transform_indices = @transform_8, window_bounds = array<i64: 16, 32>}]} {
    %c0_i32 = arith.constant 0 : i32
    %0 = arith.cmpi eq, %arg1, %c0_i32 : i32
    %1 = arith.extui %0 : i1 to i32
    %c0_i32_0 = arith.constant 0 : i32
    %2 = arith.cmpi ne, %1, %c0_i32_0 : i32
    scf.if %2 {
      %cst_16 = arith.constant 0.000000e+00 : f32
      %19 = vector.broadcast %cst_16 : f32 to vector<16x32xf32>
      %c0_17 = arith.constant 0 : index
      %c0_18 = arith.constant 0 : index
      %20 = vector.load %arg11[%c0_17, %c0_18] : memref<16x32xf32, #tpu.memory_space<vmem>>, vector<16x32xf32>
      tpu.vector_store %arg11[%c0_17, %c0_18], %19 {strides = array<i32>} : memref<16x32xf32, #tpu.memory_space<vmem>>, vector<16x32xf32>,
    } else {
    }
    %c0 = arith.constant 0 : index
    %c0_1 = arith.constant 0 : index
    %3 = vector.load %arg2[%c0, %c0_1] : memref<16x32xf32, #tpu.memory_space<vmem>>, vector<16x32xf32>
    %c0_2 = arith.constant 0 : index
    %c0_3 = arith.constant 0 : index
    %4 = vector.load %arg3[%c0_2, %c0_3] : memref<32x64xf32, #tpu.memory_space<vmem>>, vector<32x64xf32>
    %cst = arith.constant dense<0.000000e+00> : vector<16x64xf32>
    %5 = tpu.matmul %3, %4, %cst {dimension_numbers = #tpu.dot_dimension_numbers<[1], [0], [0], [1], [0, 0, 1, 1], [], []>} : vector<16x32xf32>, vector<32x64xf32>, vector<16x64xf32> -> vector<16x64xf32>
    %c0_4 = arith.constant 0 : index
    %c0_5 = arith.constant 0 : index
    %6 = vector.load %arg4[%c0_4, %c0_5] : memref<1x64xf32, #tpu.memory_space<vmem>>, vector<1x64xf32>
    %7 = vector.broadcast %6 : vector<1x64xf32> to vector<16x64xf32>
    %8 = arith.addf %5, %7 : vector<16x64xf32>
    %cst_6 = arith.constant 0.000000e+00 : f32
    %9 = vector.broadcast %cst_6 : f32 to vector<16x64xf32>
    %10 = arith.maximumf %8, %9 : vector<16x64xf32>
    %c0_7 = arith.constant 0 : index
    %c0_8 = arith.constant 0 : index
    %11 = vector.load %arg11[%c0_7, %c0_8] : memref<16x32xf32, #tpu.memory_space<vmem>>, vector<16x32xf32>
    %c0_9 = arith.constant 0 : index
    %c0_10 = arith.constant 0 : index
    %12 = vector.load %arg5[%c0_9, %c0_10] : memref<64x32xf32, #tpu.memory_space<vmem>>, vector<64x32xf32>
    %cst_11 = arith.constant dense<0.000000e+00> : vector<16x32xf32>
    %13 = tpu.matmul %10, %12, %cst_11 {dimension_numbers = #tpu.dot_dimension_numbers<[1], [0], [0], [1], [0, 0, 1, 1], [], []>} : vector<16x64xf32>, vector<64x32xf32>, vector<16x32xf32> -> vector<16x32xf32>
    %14 = arith.addf %11, %13 : vector<16x32xf32>
    %c0_12 = arith.constant 0 : index
    %c0_13 = arith.constant 0 : index
    %15 = vector.load %arg11[%c0_12, %c0_13] : memref<16x32xf32, #tpu.memory_space<vmem>>, vector<16x32xf32>
    tpu.vector_store %arg11[%c0_12, %c0_13], %14 {strides = array<i32>} : memref<16x32xf32, #tpu.memory_space<vmem>>, vector<16x32xf32>,
    %c0_i32_14 = arith.constant 0 : i32
    %16 = arith.cmpi eq, %arg1, %c0_i32_14 : i32
    %17 = arith.extui %16 : i1 to i32
    %c0_i32_15 = arith.constant 0 : i32
    %18 = arith.cmpi ne, %17, %c0_i32_15 : i32
    scf.if %18 {
      %c0_16 = arith.constant 0 : index
      %c0_17 = arith.constant 0 : index
      %19 = vector.load %arg11[%c0_16, %c0_17] : memref<16x32xf32, #tpu.memory_space<vmem>>, vector<16x32xf32>
      %c0_18 = arith.constant 0 : index
      %c0_19 = arith.constant 0 : index
      %20 = vector.load %arg6[%c0_18, %c0_19] : memref<1x32xf32, #tpu.memory_space<vmem>>, vector<1x32xf32>
      %21 = vector.broadcast %20 : vector<1x32xf32> to vector<16x32xf32>
      %22 = arith.addf %19, %21 : vector<16x32xf32>
      %c0_20 = arith.constant 0 : index
      %c0_21 = arith.constant 0 : index
      %23 = vector.load %arg7[%c0_20, %c0_21] : memref<16x32xf32, #tpu.memory_space<vmem>>, vector<16x32xf32>
      %24 = arith.addf %22, %23 : vector<16x32xf32>
      %cst_22 = arith.constant dense<0.000000e+00> : vector<16xf32>
      %25 = vector.multi_reduction <add>, %24, %cst_22 [1] : vector<16x32xf32> to vector<16xf32>
      %26 = vector.shape_cast %25 : vector<16xf32> to vector<16x1xf32>
      %cst_23 = arith.constant 3.200000e+01 : f32
      %27 = vector.broadcast %cst_23 : f32 to vector<16x1xf32>
      %28 = arith.divf %26, %27 : vector<16x1xf32>
      %29 = vector.broadcast %28 : vector<16x1xf32> to vector<16x32xf32>
      %30 = arith.subf %24, %29 : vector<16x32xf32>
      %31 = arith.mulf %30, %30 : vector<16x32xf32>
      %cst_24 = arith.constant dense<0.000000e+00> : vector<16xf32>
      %32 = vector.multi_reduction <add>, %31, %cst_24 [1] : vector<16x32xf32> to vector<16xf32>
      %33 = vector.shape_cast %32 : vector<16xf32> to vector<16x1xf32>
      %cst_25 = arith.constant 3.200000e+01 : f32
      %34 = vector.broadcast %cst_25 : f32 to vector<16x1xf32>
      %35 = arith.divf %33, %34 : vector<16x1xf32>
      %36 = vector.broadcast %28 : vector<16x1xf32> to vector<16x32xf32>
      %37 = arith.subf %24, %36 : vector<16x32xf32>
      %cst_26 = arith.constant 9.99999974E-6 : f32
      %38 = vector.broadcast %cst_26 : f32 to vector<16x1xf32>
      %39 = arith.addf %35, %38 : vector<16x1xf32>
      %40 = math.rsqrt %39 : vector<16x1xf32>
      %41 = vector.broadcast %40 : vector<16x1xf32> to vector<16x32xf32>
      %42 = arith.mulf %37, %41 : vector<16x32xf32>
      %c0_27 = arith.constant 0 : index
      %c0_28 = arith.constant 0 : index
      %43 = vector.load %arg8[%c0_27, %c0_28] : memref<1x32xf32, #tpu.memory_space<vmem>>, vector<1x32xf32>
      %44 = vector.broadcast %43 : vector<1x32xf32> to vector<16x32xf32>
      %45 = arith.mulf %42, %44 : vector<16x32xf32>
      %c0_29 = arith.constant 0 : index
      %c0_30 = arith.constant 0 : index
      %46 = vector.load %arg9[%c0_29, %c0_30] : memref<1x32xf32, #tpu.memory_space<vmem>>, vector<1x32xf32>
      %47 = vector.broadcast %46 : vector<1x32xf32> to vector<16x32xf32>
      %48 = arith.addf %45, %47 : vector<16x32xf32>
      %c0_31 = arith.constant 0 : index
      %c0_32 = arith.constant 0 : index
      %49 = vector.load %arg10[%c0_31, %c0_32] : memref<16x32xf32, #tpu.memory_space<vmem>>, vector<16x32xf32>
      tpu.vector_store %arg10[%c0_31, %c0_32], %48 {strides = array<i32>} : memref<16x32xf32, #tpu.memory_space<vmem>>, vector<16x32xf32>,
    } else {
    }
    return
  }
  func.func @transform_0(%arg0: i32, %arg1: i32) -> (i32, i32) {
    %c0_i32 = arith.constant 0 : i32
    %c0_i32_0 = arith.constant 0 : i32
    return %arg0, %c0_i32 : i32, i32
  }
  func.func @transform_1(%arg0: i32, %arg1: i32) -> (i32, i32) {
    %c0_i32 = arith.constant 0 : i32
    %c0_i32_0 = arith.constant 0 : i32
    return %c0_i32, %arg1 : i32, i32
  }
  func.func @transform_2(%arg0: i32, %arg1: i32) -> (i32, i32) {
    %c0_i32 = arith.constant 0 : i32
    %c0_i32_0 = arith.constant 0 : i32
    return %c0_i32, %arg1 : i32, i32
  }
  func.func @transform_3(%arg0: i32, %arg1: i32) -> (i32, i32) {
    %c0_i32 = arith.constant 0 : i32
    %c0_i32_0 = arith.constant 0 : i32
    return %arg1, %c0_i32 : i32, i32
  }
  func.func @transform_4(%arg0: i32, %arg1: i32) -> (i32, i32) {
    %c0_i32 = arith.constant 0 : i32
    %c0_i32_0 = arith.constant 0 : i32
    %c0_i32_1 = arith.constant 0 : i32
    return %c0_i32, %c0_i32_0 : i32, i32
  }
  func.func @transform_5(%arg0: i32, %arg1: i32) -> (i32, i32) {
    %c0_i32 = arith.constant 0 : i32
    %c0_i32_0 = arith.constant 0 : i32
    return %arg0, %c0_i32 : i32, i32
  }
  func.func @transform_6(%arg0: i32, %arg1: i32) -> (i32, i32) {
    %c0_i32 = arith.constant 0 : i32
    %c0_i32_0 = arith.constant 0 : i32
    %c0_i32_1 = arith.constant 0 : i32
    return %c0_i32, %c0_i32_0 : i32, i32
  }
  func.func @transform_7(%arg0: i32, %arg1: i32) -> (i32, i32) {
    %c0_i32 = arith.constant 0 : i32
    %c0_i32_0 = arith.constant 0 : i32
    %c0_i32_1 = arith.constant 0 : i32
    return %c0_i32, %c0_i32_0 : i32, i32
  }
  func.func @transform_8(%arg0: i32, %arg1: i32) -> (i32, i32) {
    %c0_i32 = arith.constant 0 : i32
    %c0_i32_0 = arith.constant 0 : i32
    return %arg0, %c0_i32 : i32, i32
  }
}

module attributes {stable_mosaic.version = 11 : i64} {
  func.func @_ffn_residual_ln_kernel(%arg0: i32, %arg1: i32, %arg2: memref<16x32xf32, #tpu.memory_space<vmem>>, %arg3: memref<32x64xf32, #tpu.memory_space<vmem>>, %arg4: memref<1x64xf32, #tpu.memory_space<vmem>>, %arg5: memref<64x32xf32, #tpu.memory_space<vmem>>, %arg6: memref<1x32xf32, #tpu.memory_space<vmem>>, %arg7: memref<16x32xf32, #tpu.memory_space<vmem>>, %arg8: memref<1x32xf32, #tpu.memory_space<vmem>>, %arg9: memref<1x32xf32, #tpu.memory_space<vmem>>, %arg10: memref<16x32xf32, #tpu.memory_space<vmem>>, %arg11: memref<16x32xf32, #tpu.memory_space<vmem>>) attributes {dimension_semantics = [#tpu.dimension_semantics<parallel>, #tpu.dimension_semantics<arbitrary>], iteration_bounds = array<i64: 1, 1>, scalar_prefetch = 0 : i64, scratch_operands = 1 : i64, tpu.core_type = #tpu.core_type<tc>, window_params = [{transform_indices = @transform_0, window_bounds = array<i64: 16, 32>}, {transform_indices = @transform_1, window_bounds = array<i64: 32, 64>}, {transform_indices = @transform_2, window_bounds = array<i64: 1, 64>}, {transform_indices = @transform_3, window_bounds = array<i64: 64, 32>}, {pipeline_mode = #tpu.pipeline_mode<synchronous>, transform_indices = @transform_4, window_bounds = array<i64: 1, 32>}, {transform_indices = @transform_5, window_bounds = array<i64: 16, 32>}, {pipeline_mode = #tpu.pipeline_mode<synchronous>, transform_indices = @transform_6, window_bounds = array<i64: 1, 32>}, {pipeline_mode = #tpu.pipeline_mode<synchronous>, transform_indices = @transform_7, window_bounds = array<i64: 1, 32>}, {transform_indices = @transform_8, window_bounds = array<i64: 16, 32>}]} {
    %c0_i32 = arith.constant 0 : i32
    %0 = arith.cmpi eq, %arg1, %c0_i32 : i32
    %1 = arith.extui %0 : i1 to i32
    %c0_i32_0 = arith.constant 0 : i32
    %2 = arith.cmpi ne, %1, %c0_i32_0 : i32
    scf.if %2 {
      %cst_16 = arith.constant 0.000000e+00 : f32
      %19 = vector.broadcast %cst_16 : f32 to vector<16x32xf32>
      %c0_17 = arith.constant 0 : index
      %c0_18 = arith.constant 0 : index
      %20 = vector.load %arg11[%c0_17, %c0_18] : memref<16x32xf32, #tpu.memory_space<vmem>>, vector<16x32xf32>
      tpu.vector_store %arg11[%c0_17, %c0_18], %19 {strides = array<i32>} : memref<16x32xf32, #tpu.memory_space<vmem>>, vector<16x32xf32>,
    } else {
    }
    %c0 = arith.constant 0 : index
    %c0_1 = arith.constant 0 : index
    %3 = vector.load %arg2[%c0, %c0_1] : memref<16x32xf32, #tpu.memory_space<vmem>>, vector<16x32xf32>
    %c0_2 = arith.constant 0 : index
    %c0_3 = arith.constant 0 : index
    %4 = vector.load %arg3[%c0_2, %c0_3] : memref<32x64xf32, #tpu.memory_space<vmem>>, vector<32x64xf32>
    %cst = arith.constant dense<0.000000e+00> : vector<16x64xf32>
    %5 = tpu.matmul %3, %4, %cst {dimension_numbers = #tpu.dot_dimension_numbers<[1], [0], [0], [1], [0, 0, 1, 1], [], []>} : vector<16x32xf32>, vector<32x64xf32>, vector<16x64xf32> -> vector<16x64xf32>
    %c0_4 = arith.constant 0 : index
    %c0_5 = arith.constant 0 : index
    %6 = vector.load %arg4[%c0_4, %c0_5] : memref<1x64xf32, #tpu.memory_space<vmem>>, vector<1x64xf32>
    %7 = vector.broadcast %6 : vector<1x64xf32> to vector<16x64xf32>
    %8 = arith.addf %5, %7 : vector<16x64xf32>
    %cst_6 = arith.constant 0.000000e+00 : f32
    %9 = vector.broadcast %cst_6 : f32 to vector<16x64xf32>
    %10 = arith.maximumf %8, %9 : vector<16x64xf32>
    %c0_7 = arith.constant 0 : index
    %c0_8 = arith.constant 0 : index
    %11 = vector.load %arg11[%c0_7, %c0_8] : memref<16x32xf32, #tpu.memory_space<vmem>>, vector<16x32xf32>
    %c0_9 = arith.constant 0 : index
    %c0_10 = arith.constant 0 : index
    %12 = vector.load %arg5[%c0_9, %c0_10] : memref<64x32xf32, #tpu.memory_space<vmem>>, vector<64x32xf32>
    %cst_11 = arith.constant dense<0.000000e+00> : vector<16x32xf32>
    %13 = tpu.matmul %10, %12, %cst_11 {dimension_numbers = #tpu.dot_dimension_numbers<[1], [0], [0], [1], [0, 0, 1, 1], [], []>} : vector<16x64xf32>, vector<64x32xf32>, vector<16x32xf32> -> vector<16x32xf32>
    %14 = arith.addf %11, %13 : vector<16x32xf32>
    %c0_12 = arith.constant 0 : index
    %c0_13 = arith.constant 0 : index
    %15 = vector.load %arg11[%c0_12, %c0_13] : memref<16x32xf32, #tpu.memory_space<vmem>>, vector<16x32xf32>
    tpu.vector_store %arg11[%c0_12, %c0_13], %14 {strides = array<i32>} : memref<16x32xf32, #tpu.memory_space<vmem>>, vector<16x32xf32>,
    %c0_i32_14 = arith.constant 0 : i32
    %16 = arith.cmpi eq, %arg1, %c0_i32_14 : i32
    %17 = arith.extui %16 : i1 to i32
    %c0_i32_15 = arith.constant 0 : i32
    %18 = arith.cmpi ne, %17, %c0_i32_15 : i32
    scf.if %18 {
      %c0_16 = arith.constant 0 : index
      %c0_17 = arith.constant 0 : index
      %19 = vector.load %arg11[%c0_16, %c0_17] : memref<16x32xf32, #tpu.memory_space<vmem>>, vector<16x32xf32>
      %c0_18 = arith.constant 0 : index
      %c0_19 = arith.constant 0 : index
      %20 = vector.load %arg6[%c0_18, %c0_19] : memref<1x32xf32, #tpu.memory_space<vmem>>, vector<1x32xf32>
      %21 = vector.broadcast %20 : vector<1x32xf32> to vector<16x32xf32>
      %22 = arith.addf %19, %21 : vector<16x32xf32>
      %c0_20 = arith.constant 0 : index
      %c0_21 = arith.constant 0 : index
      %23 = vector.load %arg7[%c0_20, %c0_21] : memref<16x32xf32, #tpu.memory_space<vmem>>, vector<16x32xf32>
      %24 = arith.addf %22, %23 : vector<16x32xf32>
      %cst_22 = arith.constant dense<0.000000e+00> : vector<16xf32>
      %25 = vector.multi_reduction <add>, %24, %cst_22 [1] : vector<16x32xf32> to vector<16xf32>
      %26 = vector.shape_cast %25 : vector<16xf32> to vector<16x1xf32>
      %cst_23 = arith.constant 3.200000e+01 : f32
      %27 = vector.broadcast %cst_23 : f32 to vector<16x1xf32>
      %28 = arith.divf %26, %27 : vector<16x1xf32>
      %29 = vector.broadcast %28 : vector<16x1xf32> to vector<16x32xf32>
      %30 = arith.subf %24, %29 : vector<16x32xf32>
      %31 = arith.mulf %30, %30 : vector<16x32xf32>
      %cst_24 = arith.constant dense<0.000000e+00> : vector<16xf32>
      %32 = vector.multi_reduction <add>, %31, %cst_24 [1] : vector<16x32xf32> to vector<16xf32>
      %33 = vector.shape_cast %32 : vector<16xf32> to vector<16x1xf32>
      %cst_25 = arith.constant 3.200000e+01 : f32
      %34 = vector.broadcast %cst_25 : f32 to vector<16x1xf32>
      %35 = arith.divf %33, %34 : vector<16x1xf32>
      %36 = vector.broadcast %28 : vector<16x1xf32> to vector<16x32xf32>
      %37 = arith.subf %24, %36 : vector<16x32xf32>
      %cst_26 = arith.constant 9.99999974E-6 : f32
      %38 = vector.broadcast %cst_26 : f32 to vector<16x1xf32>
      %39 = arith.addf %35, %38 : vector<16x1xf32>
      %40 = math.rsqrt %39 : vector<16x1xf32>
      %41 = vector.broadcast %40 : vector<16x1xf32> to vector<16x32xf32>
      %42 = arith.mulf %37, %41 : vector<16x32xf32>
      %c0_27 = arith.constant 0 : index
      %c0_28 = arith.constant 0 : index
      %43 = vector.load %arg8[%c0_27, %c0_28] : memref<1x32xf32, #tpu.memory_space<vmem>>, vector<1x32xf32>
      %44 = vector.broadcast %43 : vector<1x32xf32> to vector<16x32xf32>
      %45 = arith.mulf %42, %44 : vector<16x32xf32>
      %c0_29 = arith.constant 0 : index
      %c0_30 = arith.constant 0 : index
      %46 = vector.load %arg9[%c0_29, %c0_30] : memref<1x32xf32, #tpu.memory_space<vmem>>, vector<1x32xf32>
      %47 = vector.broadcast %46 : vector<1x32xf32> to vector<16x32xf32>
      %48 = arith.addf %45, %47 : vector<16x32xf32>
      %c0_31 = arith.constant 0 : index
      %c0_32 = arith.constant 0 : index
      %49 = vector.load %arg10[%c0_31, %c0_32] : memref<16x32xf32, #tpu.memory_space<vmem>>, vector<16x32xf32>
      tpu.vector_store %arg10[%c0_31, %c0_32], %48 {strides = array<i32>} : memref<16x32xf32, #tpu.memory_space<vmem>>, vector<16x32xf32>,
    } else {
    }
    return
  }
  func.func @transform_0(%arg0: i32, %arg1: i32) -> (i32, i32) {
    %c0_i32 = arith.constant 0 : i32
    %c0_i32_0 = arith.constant 0 : i32
    return %arg0, %c0_i32 : i32, i32
  }
  func.func @transform_1(%arg0: i32, %arg1: i32) -> (i32, i32) {
    %c0_i32 = arith.constant 0 : i32
    %c0_i32_0 = arith.constant 0 : i32
    return %c0_i32, %arg1 : i32, i32
  }
  func.func @transform_2(%arg0: i32, %arg1: i32) -> (i32, i32) {
    %c0_i32 = arith.constant 0 : i32
    %c0_i32_0 = arith.constant 0 : i32
    return %c0_i32, %arg1 : i32, i32
  }
  func.func @transform_3(%arg0: i32, %arg1: i32) -> (i32, i32) {
    %c0_i32 = arith.constant 0 : i32
    %c0_i32_0 = arith.constant 0 : i32
    return %arg1, %c0_i32 : i32, i32
  }
  func.func @transform_4(%arg0: i32, %arg1: i32) -> (i32, i32) {
    %c0_i32 = arith.constant 0 : i32
    %c0_i32_0 = arith.constant 0 : i32
    %c0_i32_1 = arith.constant 0 : i32
    return %c0_i32, %c0_i32_0 : i32, i32
  }
  func.func @transform_5(%arg0: i32, %arg1: i32) -> (i32, i32) {
    %c0_i32 = arith.constant 0 : i32
    %c0_i32_0 = arith.constant 0 : i32
    return %arg0, %c0_i32 : i32, i32
  }
  func.func @transform_6(%arg0: i32, %arg1: i32) -> (i32, i32) {
    %c0_i32 = arith.constant 0 : i32
    %c0_i32_0 = arith.constant 0 : i32
    %c0_i32_1 = arith.constant 0 : i32
    return %c0_i32, %c0_i32_0 : i32, i32
  }
  func.func @transform_7(%arg0: i32, %arg1: i32) -> (i32, i32) {
    %c0_i32 = arith.constant 0 : i32
    %c0_i32_0 = arith.constant 0 : i32
    %c0_i32_1 = arith.constant 0 : i32
    return %c0_i32, %c0_i32_0 : i32, i32
  }
  func.func @transform_8(%arg0: i32, %arg1: i32) -> (i32, i32) {
    %c0_i32 = arith.constant 0 : i32
    %c0_i32_0 = arith.constant 0 : i32
    return %arg0, %c0_i32 : i32, i32
  }
}

</mosaic_0001>

<bundles_post_ra>
// kernel: decoder_forward.16
= control target key start
LH: loop header
LB: loop body
LE: loop exit
PB: predicated region body
PF: predicated region fallthrough
CT: control target
= control target key end

     0   :  { %vm29_vm0 = vcmask 261120   ;;  %vm18_vm1 = vcmask 785408   ;;  %v165_v3 = vmov 0.0   ;;  %s221_s1 = inlined_call_operand.vmem [shape: f32[32,96], index: 1, kind: input, shape index: {}]   ;;  %s222_s0 = inlined_call_operand.vmem [shape: f32[16,32], index: 0, kind: input, shape index: {}]   ;;  %s223_s2 = inlined_call_operand.vmem [shape: f32[1,96], index: 2, kind: input, shape index: {}]   ;;  %s224_s3 = inlined_call_operand.vmem [shape: f32[16,96], index: 3, kind: output, shape index: {}]  }
   0x1   :  { %v25_v0 = vld [vmem:[%s221_s1] sm:$0xff]  ;;  %v26_v1 = vld [vmem:[%s221_s1 + $0x8] sm:$0xff]  ;;  %v27_v2 = vld [vmem:[%s221_s1 + $0x10] sm:$0xff]  ;;  %20 = vst.msk [vmem:[#allocation2 + $0x8] sm:$0xff] %vm18_vm1, %v165_v3 }
   0x2   :  { %19 = vst.msk [vmem:[#allocation2] sm:$0xff] %vm18_vm1, %v165_v3  ;;  %v156_v4 = vpack.c.bf16 %v26_v1, %v25_v0  ;;  %v28_v5 = vld [vmem:[%s221_s1 + $0x18] sm:$0xff]  ;;  %v23_v6 = vld [vmem:[%s222_s0] sm:$0xff]  ;;  %v24_v8 = vld [vmem:[%s222_s0 + $0x8] sm:$0xff] }
   0x3   :  { %v160_v7 = vpack.c.bf16 %v28_v5, %v27_v2  ;;  %153 = vmatprep.mubr.msk.f32.mxu0 %vm29_vm0, %v23_v6  ;;  %v138_v15 = vld [vmem:[%s223_s2] ss:$0 sm:$0xff] }
   0x4   :  { %157 = vmatprep.subr.bf16.mxu0 %v156_v4 }
   0x5   :  { %159 = vmatpush3.bf16.msra.mxu0 %v156_v4 }
   0x6   :  { %161 = vmatprep.subr.bf16.mxu0 %v160_v7 }
   0x8   :  { %v22_v9 = vld [vmem:[#allocation2 + $0x8] sm:$0xff] }
   0x9   :  { %163 = vmatpush3.bf16.msra.mxu0 %v160_v7  ;;  %v21_v10 = vld [vmem:[#allocation2] sm:$0xff] }
   0xc   :  { %154 = vmatmul.mubr.msk.f32.vlgmr.msra.gmra.mrb[0].mxu0 %vm29_vm0, %v24_v8 }
  0xdf   :  { %v155_v11 = vpop.f32.mrb[0].mxu0 }
  0xe0   :  { %v112_v12 = vadd.f32 %v155_v11, %v22_v9  ;;  %v102_v13 = vpop.f32.mrb[1].mxu0 }
  0xe1   :  { %v111_v14 = vadd.f32 %v102_v13, %v21_v10 }
  0xe2   :  { %115 = vst.msk [vmem:[#allocation2 + $0x8] sm:$0xff] %vm18_vm1, %v112_v12 }
  0xe3   :  { %114 = vst.msk [vmem:[#allocation2] sm:$0xff] %vm18_vm1, %v111_v14 }
  0xe9   :  { %v120_v16 = vld [vmem:[#allocation2 + $0x8] sm:$0xff] }
  0xea   :  { %v129_v17 = vadd.f32 %v138_v15, %v120_v16  ;;  %v119_v18 = vld [vmem:[#allocation2] sm:$0xff] }
  0xeb   :  { %v128_v19 = vadd.f32 %v138_v15, %v119_v18 }
  0xec   :  { %131 = vst.msk [vmem:[%s224_s3 + $0x8] sm:$0xff] %vm18_vm1, %v129_v17 }
  0xed   :  { %130 = vst.msk [vmem:[%s224_s3] sm:$0xff] %vm18_vm1, %v128_v19 }

// kernel: decoder_forward.19
= control target key start
LH: loop header
LB: loop body
LE: loop exit
PB: predicated region body
PF: predicated region fallthrough
CT: control target
= control target key end

     0   :  { %vm18_vm0 = vcmask 261120   ;;  %v164_v3 = vmov 0.0   ;;  %s220_s1 = inlined_call_operand.vmem [shape: f32[32,32], index: 1, kind: input, shape index: {}]   ;;  %s221_s0 = inlined_call_operand.vmem [shape: f32[16,32], index: 0, kind: input, shape index: {}]   ;;  %s222_s2 = inlined_call_operand.vmem [shape: f32[1,32], index: 2, kind: input, shape index: {}]   ;;  %s223_s3 = inlined_call_operand.vmem [shape: f32[16,32], index: 3, kind: output, shape index: {}]  }
   0x1   :  { %v25_v0 = vld [vmem:[%s220_s1] sm:$0xff]  ;;  %v26_v1 = vld [vmem:[%s220_s1 + $0x8] sm:$0xff]  ;;  %v27_v2 = vld [vmem:[%s220_s1 + $0x10] sm:$0xff]  ;;  %20 = vst.msk [vmem:[#allocation2 + $0x8] sm:$0xff] %vm18_vm0, %v164_v3 }
   0x2   :  { %19 = vst.msk [vmem:[#allocation2] sm:$0xff] %vm18_vm0, %v164_v3  ;;  %v155_v4 = vpack.c.bf16 %v26_v1, %v25_v0  ;;  %v28_v5 = vld [vmem:[%s220_s1 + $0x18] sm:$0xff]  ;;  %v23_v6 = vld [vmem:[%s221_s0] sm:$0xff]  ;;  %v24_v8 = vld [vmem:[%s221_s0 + $0x8] sm:$0xff] }
   0x3   :  { %v159_v7 = vpack.c.bf16 %v28_v5, %v27_v2  ;;  %152 = vmatprep.mubr.msk.f32.mxu0 %vm18_vm0, %v23_v6  ;;  %v137_v15 = vld [vmem:[%s222_s2] ss:$0 sm:$0xff] }
   0x4   :  { %156 = vmatprep.subr.bf16.mxu0 %v155_v4 }
   0x5   :  { %158 = vmatpush3.bf16.msra.mxu0 %v155_v4 }
   0x6   :  { %160 = vmatprep.subr.bf16.mxu0 %v159_v7 }
   0x8   :  { %v22_v9 = vld [vmem:[#allocation2 + $0x8] sm:$0xff] }
   0x9   :  { %162 = vmatpush3.bf16.msra.mxu0 %v159_v7  ;;  %v21_v10 = vld [vmem:[#allocation2] sm:$0xff] }
   0xc   :  { %153 = vmatmul.mubr.msk.f32.vlgmr.msra.gmra.mrb[0].mxu0 %vm18_vm0, %v24_v8 }
  0xdf   :  { %v154_v11 = vpop.f32.mrb[0].mxu0 }
  0xe0   :  { %v112_v12 = vadd.f32 %v154_v11, %v22_v9  ;;  %v102_v13 = vpop.f32.mrb[1].mxu0 }
  0xe1   :  { %v111_v14 = vadd.f32 %v102_v13, %v21_v10 }
  0xe2   :  { %114 = vst.msk [vmem:[#allocation2 + $0x8] sm:$0xff] %vm18_vm0, %v112_v12 }
  0xe3   :  { %113 = vst.msk [vmem:[#allocation2] sm:$0xff] %vm18_vm0, %v111_v14 }
  0xe9   :  { %v119_v16 = vld [vmem:[#allocation2 + $0x8] sm:$0xff] }
  0xea   :  { %v128_v17 = vadd.f32 %v137_v15, %v119_v16  ;;  %v118_v18 = vld [vmem:[#allocation2] sm:$0xff] }
  0xeb   :  { %v127_v19 = vadd.f32 %v137_v15, %v118_v18 }
  0xec   :  { %130 = vst.msk [vmem:[%s223_s3 + $0x8] sm:$0xff] %vm18_vm0, %v128_v17 }
  0xed   :  { %129 = vst.msk [vmem:[%s223_s3] sm:$0xff] %vm18_vm0, %v127_v19 }

// kernel: decoder_forward.18
= control target key start
LH: loop header
LB: loop body
LE: loop exit
PB: predicated region body
PF: predicated region fallthrough
CT: control target
= control target key end

     0   :  { %vm27_vm0 = vcmask 261120   ;;  %v228_v3 = vmov 0.0   ;;  %s315_s1 = inlined_call_operand.vmem [shape: f32[32,32], index: 1, kind: input, shape index: {}]   ;;  %s316_s0 = inlined_call_operand.vmem [shape: f32[16,32], index: 0, kind: input, shape index: {}]   ;;  %s317_s2 = inlined_call_operand.vmem [shape: f32[1,32], index: 2, kind: input, shape index: {}]   ;;  %s318_s3 = inlined_call_operand.vmem [shape: f32[16,32], index: 3, kind: input, shape index: {}]   ;;  %s319_s4 = inlined_call_operand.vmem [shape: f32[1,32], index: 4, kind: input, shape index: {}]   ;;  %s320_s5 = inlined_call_operand.vmem [shape: f32[1,32], index: 5, kind: input, shape index: {}]   ;;  %s321_s6 = inlined_call_operand.vmem [shape: f32[16,32], index: 6, kind: output, shape index: {}]  }
   0x1   :  { %v34_v0 = vld [vmem:[%s315_s1] sm:$0xff]  ;;  %v35_v1 = vld [vmem:[%s315_s1 + $0x8] sm:$0xff]  ;;  %v36_v2 = vld [vmem:[%s315_s1 + $0x10] sm:$0xff]  ;;  %29 = vst.msk [vmem:[#allocation2 + $0x8] sm:$0xff] %vm27_vm0, %v228_v3 }
   0x2   :  { %28 = vst.msk [vmem:[#allocation2] sm:$0xff] %vm27_vm0, %v228_v3  ;;  %v215_v4 = vpack.c.bf16 %v35_v1, %v34_v0  ;;  %v37_v5 = vld [vmem:[%s315_s1 + $0x18] sm:$0xff]  ;;  %v32_v6 = vld [vmem:[%s316_s0] sm:$0xff]  ;;  %v33_v8 = vld [vmem:[%s316_s0 + $0x8] sm:$0xff] }
   0x3   :  { %v219_v7 = vpack.c.bf16 %v37_v5, %v36_v2  ;;  %212 = vmatprep.mubr.msk.f32.mxu0 %vm27_vm0, %v32_v6  ;;  %v195_v15 = vld [vmem:[%s317_s2] ss:$0 sm:$0xff]  ;;  %v139_v21 = vld [vmem:[%s318_s3 + $0x8] sm:$0xff] }
   0x4   :  { %216 = vmatprep.subr.bf16.mxu0 %v215_v4  ;;  %v138_v18 = vld [vmem:[%s318_s3] sm:$0xff] }
   0x5   :  { %218 = vmatpush3.bf16.msra.mxu0 %v215_v4  ;;  %v196_v43 = vld [vmem:[%s319_s4] ss:$0 sm:$0xff] }
   0x6   :  { %220 = vmatprep.subr.bf16.mxu0 %v219_v7  ;;  %v197_v45 = vld [vmem:[%s320_s5] ss:$0 sm:$0xff] }
   0x8   :  { %v31_v9 = vld [vmem:[#allocation2 + $0x8] sm:$0xff] }
   0x9   :  { %222 = vmatpush3.bf16.msra.mxu0 %v219_v7  ;;  %v30_v10 = vld [vmem:[#allocation2] sm:$0xff] }
   0xc   :  { %213 = vmatmul.mubr.msk.f32.vlgmr.msra.gmra.mrb[0].mxu0 %vm27_vm0, %v33_v8 }
  0xdf   :  { %v214_v11 = vpop.f32.mrb[0].mxu0 }
  0xe0   :  { %v121_v12 = vadd.f32 %v214_v11, %v31_v9  ;;  %v111_v13 = vpop.f32.mrb[1].mxu0 }
  0xe1   :  { %v120_v14 = vadd.f32 %v111_v13, %v30_v10 }
  0xe2   :  { %123 = vst.msk [vmem:[#allocation2 + $0x8] sm:$0xff] %vm27_vm0, %v121_v12 }
  0xe3   :  { %122 = vst.msk [vmem:[#allocation2] sm:$0xff] %vm27_vm0, %v120_v14 }
  0xe9   :  { %v128_v16 = vld [vmem:[#allocation2 + $0x8] sm:$0xff] }
  0xea   :  { %v127_v17 = vld [vmem:[#allocation2] sm:$0xff]  ;;  %v137_v20 = vadd.f32 %v195_v15, %v128_v16 }
  0xeb   :  { %v136_v19 = vadd.f32 %v195_v15, %v127_v17 }
  0xec   :  { %v141_v24 = vadd.f32 %v139_v21, %v137_v20 }
  0xed   :  { %v140_v22 = vadd.f32 %v138_v18, %v136_v19 }
  0xee   :  { %v145_v25 = vsel %vm27_vm0, %v141_v24, 0.0 }
  0xef   :  { %v142_v23 = vsel %vm27_vm0, %v140_v22, 0.0 }
  0xf0   :  { %143 = vadd.xlane.f32.xlu0 %v142_v23 }
  0xf4   :  { %146 = vadd.xlane.f32.xlu0 %v145_v25 }
 0x17d   :  { %v144_v26 = vpop.xlane.xlu0 %143 }
 0x17e   :  { %v149_v27 = vmul.f32 0.03125, %v144_v26 }
 0x180   :  { %v151_v28 = vsub.f32 %v140_v22, %v149_v27 }
 0x181   :  { %v147_v29 = vpop.xlane.xlu0 %146 }
 0x182   :  { %v150_v30 = vmul.f32 0.03125, %v147_v29  ;;  %v153_v31 = vmul.f32 %v151_v28, %v151_v28 }
 0x184   :  { %v152_v32 = vsub.f32 %v141_v24, %v150_v30  ;;  %v155_v33 = vsel %vm27_vm0, %v153_v31, 0.0 }
 0x185   :  { %156 = vadd.xlane.f32.xlu1 %v155_v33 }
 0x186   :  { %v154_v34 = vmul.f32 %v152_v32, %v152_v32 }
 0x188   :  { %v158_v35 = vsel %vm27_vm0, %v154_v34, 0.0 }
 0x189   :  { %159 = vadd.xlane.f32.xlu1 %v158_v35 }
 0x212   :  { %v157_v36 = vpop.xlane.xlu1 %156 }
 0x213   :  { %v161_v37 = vmul.f32 0.03125, %v157_v36 }
 0x215   :  { %v163_v38 = vadd.f32 1e-05, %v161_v37 }
 0x216   :  { %v160_v39 = vpop.xlane.xlu1 %159 }
 0x217   :  { %224 = vrsqrt.f32 %v163_v38  ;;  %v162_v40 = vmul.f32 0.03125, %v160_v39 }
 0x219   :  { %v164_v41 = vadd.f32 1e-05, %v162_v40 }
 0x21b   :  { %226 = vrsqrt.f32 %v164_v41 }
 0x221   :  { %v225_v42 = vpop.eup %224 }
 0x222   :  { %v167_v44 = vmul.f32 %v225_v42, %v151_v28 }
 0x224   :  { %v176_v46 = vmul.f32 %v196_v43, %v167_v44 }
 0x225   :  { %v227_v47 = vpop.eup %226 }
 0x226   :  { %v185_v48 = vadd.f32 %v197_v45, %v176_v46  ;;  %v168_v49 = vmul.f32 %v227_v47, %v152_v32 }
 0x228   :  { %187 = vst.msk [vmem:[%s321_s6] sm:$0xff] %vm27_vm0, %v185_v48  ;;  %v177_v50 = vmul.f32 %v196_v43, %v168_v49 }
 0x22a   :  { %v186_v51 = vadd.f32 %v197_v45, %v177_v50 }
 0x22c   :  { %188 = vst.msk [vmem:[%s321_s6 + $0x8] sm:$0xff] %vm27_vm0, %v186_v51 }

// kernel: decoder_forward.20
= control target key start
LH: loop header
LB: loop body
LE: loop exit
PB: predicated region body
PF: predicated region fallthrough
CT: control target
= control target key end

     0   :  { %vm29_vm0 = vcmask 261120   ;;  %vm18_vm1 = vcmask 523264   ;;  %v165_v3 = vmov 0.0   ;;  %s221_s1 = inlined_call_operand.vmem [shape: f32[32,64], index: 1, kind: input, shape index: {}]   ;;  %s222_s0 = inlined_call_operand.vmem [shape: f32[16,32], index: 0, kind: input, shape index: {}]   ;;  %s223_s2 = inlined_call_operand.vmem [shape: f32[1,64], index: 2, kind: input, shape index: {}]   ;;  %s224_s3 = inlined_call_operand.vmem [shape: f32[16,64], index: 3, kind: output, shape index: {}]  }
   0x1   :  { %v25_v0 = vld [vmem:[%s221_s1] sm:$0xff]  ;;  %v26_v1 = vld [vmem:[%s221_s1 + $0x8] sm:$0xff]  ;;  %v27_v2 = vld [vmem:[%s221_s1 + $0x10] sm:$0xff]  ;;  %20 = vst.msk [vmem:[#allocation2 + $0x8] sm:$0xff] %vm18_vm1, %v165_v3 }
   0x2   :  { %19 = vst.msk [vmem:[#allocation2] sm:$0xff] %vm18_vm1, %v165_v3  ;;  %v156_v4 = vpack.c.bf16 %v26_v1, %v25_v0  ;;  %v28_v5 = vld [vmem:[%s221_s1 + $0x18] sm:$0xff]  ;;  %v23_v6 = vld [vmem:[%s222_s0] sm:$0xff]  ;;  %v24_v8 = vld [vmem:[%s222_s0 + $0x8] sm:$0xff] }
   0x3   :  { %v160_v7 = vpack.c.bf16 %v28_v5, %v27_v2  ;;  %153 = vmatprep.mubr.msk.f32.mxu0 %vm29_vm0, %v23_v6  ;;  %v138_v15 = vld [vmem:[%s223_s2] ss:$0 sm:$0xff] }
   0x4   :  { %157 = vmatprep.subr.bf16.mxu0 %v156_v4 }
   0x5   :  { %159 = vmatpush3.bf16.msra.mxu0 %v156_v4 }
   0x6   :  { %161 = vmatprep.subr.bf16.mxu0 %v160_v7 }
   0x8   :  { %v22_v9 = vld [vmem:[#allocation2 + $0x8] sm:$0xff] }
   0x9   :  { %163 = vmatpush3.bf16.msra.mxu0 %v160_v7  ;;  %v21_v10 = vld [vmem:[#allocation2] sm:$0xff] }
   0xc   :  { %154 = vmatmul.mubr.msk.f32.vlgmr.msra.gmra.mrb[0].mxu0 %vm29_vm0, %v24_v8 }
  0xdf   :  { %v155_v11 = vpop.f32.mrb[0].mxu0 }
  0xe0   :  { %v112_v12 = vadd.f32 %v155_v11, %v22_v9  ;;  %v102_v13 = vpop.f32.mrb[1].mxu0 }
  0xe1   :  { %v111_v14 = vadd.f32 %v102_v13, %v21_v10 }
  0xe2   :  { %115 = vst.msk [vmem:[#allocation2 + $0x8] sm:$0xff] %vm18_vm1, %v112_v12 }
  0xe3   :  { %114 = vst.msk [vmem:[#allocation2] sm:$0xff] %vm18_vm1, %v111_v14 }
  0xe9   :  { %v120_v16 = vld [vmem:[#allocation2 + $0x8] sm:$0xff] }
  0xea   :  { %v129_v17 = vadd.f32 %v138_v15, %v120_v16  ;;  %v119_v18 = vld [vmem:[#allocation2] sm:$0xff] }
  0xeb   :  { %v128_v19 = vadd.f32 %v138_v15, %v119_v18 }
  0xec   :  { %131 = vst.msk [vmem:[%s224_s3 + $0x8] sm:$0xff] %vm18_vm1, %v129_v17 }
  0xed   :  { %130 = vst.msk [vmem:[%s224_s3] sm:$0xff] %vm18_vm1, %v128_v19 }

// kernel: decoder_forward.17
= control target key start
LH: loop header
LB: loop body
LE: loop exit
PB: predicated region body
PF: predicated region fallthrough
CT: control target
= control target key end

     0   :  { %s1389_s12 = smov 0   ;;  %s1391_s13 = smov 0   ;;  %s1538_s0 = inlined_call_operand.vmem [shape: f32[2,4,8,8], index: 0, kind: input, shape index: {}]   ;;  %s1539_s1 = inlined_call_operand.vmem [shape: f32[2,4,8,8], index: 1, kind: input, shape index: {}]   ;;  %s1540_s2 = inlined_call_operand.vmem [shape: f32[2,4,8,8], index: 2, kind: input, shape index: {}]   ;;  %s1541_s3 = inlined_call_operand.vmem [shape: f32[2,4,8,8], index: 3, kind: output, shape index: {}]  }
   0x1   :  { %s1393_s14 = smov 0  }
   0x2 LB: > { %s32_s15 = sadd.s32 1, %s1359_s13  ;;  %p1204_p0 = scmp.ge.s32.totalorder %s1363_s14, 1  ;;  %s1363_s14 = sphi %s1393_s14, %s13_s14   ;;  %s1359_s13 = sphi %s1391_s13, %s1543_s13   ;;  %s1355_s12 = sphi %s1389_s12, %s1542_s12  }
   0x3   : > { %p34_p1 = scmp.ge.s32.totalorder %s32_s15, 2  ;;  %p193_p2 = scmp.lt.s32.totalorder %s1363_s14, 3 }
   0x5   : > { %s1545_s15 = smov (%p34_p1, %s32_s15), 0  ;;  %p194_p3 = pnand %p1204_p0, %p193_p2 }
   0x6   : > { %p239_p4 = scmp.lt.s32.totalorder (!%p194_p3), %s1355_s12, 1  ;;  %vm284_vm0 = vcmask (!%p194_p3), 64512   ;;  %v1365_v0 = vmov (!%p194_p3), 0.0   ;;  %vm1366_vm1 = vmmov (!%p194_p3), 0   ;;  %vm275_vm2 = vcmask (!%p194_p3), 7168  }
   0x7   : > { %197 = sbr.rel (%p194_p3) target bundleno = 830 (0x33e), region = 32  ;;  %1247 = vmatprep.subr.mxu0 (!%p194_p3), %v1365_v0  ;;  %285 = vst.msk [vmem:[#allocation4] sm:$0xff] (!%p194_p3), %vm284_vm0, %v1365_v0  ;;  %286 = vst.msk [vmem:[#allocation4 + $0x8] sm:$0xff] (!%p194_p3), %vm284_vm0, %v1365_v0  ;;  %1249 = vmatprep.mubr.msk.f32.mxu0 (!%p194_p3), %vm1366_vm1, %v1365_v0  ;;  %v1367_v9 = vmov (!%p194_p3), -inf   ;;  %v1368_v26 = vmov (!%p194_p3), 0  }
   0x8   : > { %287 = vst.msk [vmem:[#allocation4 + $0x10] sm:$0xff] (!%p194_p3), %vm284_vm0, %v1365_v0  ;;  %288 = vst.msk [vmem:[#allocation4 + $0x18] sm:$0xff] (!%p194_p3), %vm284_vm0, %v1365_v0  ;;  %1252 = vmatprep.subr.mxu1 (!%p194_p3), %v1365_v0  ;;  %1254 = vmatprep.mubr.msk.f32.mxu1 (!%p194_p3), %vm1366_vm1, %v1365_v0 }
   0x9   : > { %276 = vst.msk [vmem:[#allocation2] sm:$0xff] (!%p194_p3), %vm275_vm2, %v1367_v9  ;;  %277 = vst.msk [vmem:[#allocation2 + $0x8] sm:$0xff] (!%p194_p3), %vm275_vm2, %v1367_v9  ;;  %1315 = vset.pattern.permute.xlu0 (!%p194_p3), %v1368_v26  ;;  %1316 = vset.pattern.permute.xlu1 (!%p194_p3), %v1368_v26 }
   0xa   : > { %278 = vst.msk [vmem:[#allocation2 + $0x10] sm:$0xff] (!%p194_p3), %vm275_vm2, %v1367_v9  ;;  %279 = vst.msk [vmem:[#allocation2 + $0x18] sm:$0xff] (!%p194_p3), %vm275_vm2, %v1367_v9 }
   0xb   : > { %280 = vst.msk [vmem:[#allocation3] sm:$0xff] (!%p194_p3), %vm275_vm2, %v1365_v0  ;;  %281 = vst.msk [vmem:[#allocation3 + $0x8] sm:$0xff] (!%p194_p3), %vm275_vm2, %v1365_v0 }
   0xc   : > { %282 = vst.msk [vmem:[#allocation3 + $0x10] sm:$0xff] (!%p194_p3), %vm275_vm2, %v1365_v0  ;;  %283 = vst.msk [vmem:[#allocation3 + $0x18] sm:$0xff] (!%p194_p3), %vm275_vm2, %v1365_v0 }
   0xe   : > { %s1547_s12 = smov (!%p239_p4, %s1355_s12), 1 }
   0xf   : > { %s1421_s16 = sshll.u32 %s1547_s12, 5 }
  0x10   : > { %s254_s19 = scalar_lea.vmem %s1539_s1, %s1421_s16  ;;  %s246_s22 = scalar_lea.vmem %s1538_s0, %s1421_s16  ;;  %v1467_v27 = vld [vmem:[#allocation2] sm:$0xff]  ;;  %v1472_v30 = vld [vmem:[#allocation2 + $0x8] sm:$0xff] }
  0x11   : > { %v293_v1 = vld [vmem:[%s254_s19] sm:$0xff]  ;;  %v294_v2 = vld [vmem:[%s254_s19 + $0x8] sm:$0xff]  ;;  %v295_v5 = vld [vmem:[%s254_s19 + $0x10] sm:$0xff]  ;;  %s262_s25 = scalar_lea.vmem %s1540_s2, %s1421_s16  ;;  %s270_s28 = scalar_lea.vmem %s1541_s3, %s1421_s16 }
  0x12   : > { %1248 = vmatpush3.xpose.msk.msra.mxu0 %vm284_vm0, %v293_v1  ;;  %v289_v3 = vld [vmem:[%s246_s22] sm:$0xff]  ;;  %1253 = vmatpush3.xpose.msk.msra.mxu1 %vm284_vm0, %v294_v2  ;;  %v290_v4 = vld [vmem:[%s246_s22 + $0x8] sm:$0xff]  ;;  %v296_v6 = vld [vmem:[%s254_s19 + $0x18] sm:$0xff] }
  0x13   : > { %1257 = vmatprep.subr.mxu0 %v1365_v0  ;;  %1262 = vmatprep.subr.mxu1 %v1365_v0  ;;  %v291_v7 = vld [vmem:[%s246_s22 + $0x10] sm:$0xff]  ;;  %v292_v8 = vld [vmem:[%s246_s22 + $0x18] sm:$0xff]  ;;  %v297_v43 = vld [vmem:[%s262_s25] sm:$0xff] }
  0x14   : > { %v1474_v31 = vld [vmem:[#allocation2 + $0x10] sm:$0xff]  ;;  %v1483_v37 = vld [vmem:[#allocation2 + $0x18] sm:$0xff]  ;;  %v298_v44 = vld [vmem:[%s262_s25 + $0x8] sm:$0xff] }
  0x15   : > { %1250 = vmatmul.mubr.msk.f32.vlgmr.msra.gmra.mrb[0].mxu0 %vm284_vm0, %v289_v3  ;;  %1255 = vmatmul.mubr.msk.f32.vlgmr.msra.gmra.mrb[0].mxu1 %vm284_vm0, %v290_v4  ;;  %v299_v56 = vld [vmem:[%s262_s25 + $0x10] sm:$0xff]  ;;  %v300_v60 = vld [vmem:[%s262_s25 + $0x18] sm:$0xff] }
  0x16   : > { %1258 = vmatpush3.xpose.msk.msra.mxu0 %vm284_vm0, %v295_v5  ;;  %1259 = vmatprep.mubr.msk.f32.mxu0 %vm1366_vm1, %v1365_v0 }
  0x17   : > { %1263 = vmatpush3.xpose.msk.msra.mxu1 %vm284_vm0, %v296_v6  ;;  %1264 = vmatprep.mubr.msk.f32.mxu1 %vm1366_vm1, %v1365_v0 }
  0x18   : > { %1267 = vmatprep.subr.mxu0 %v1365_v0  ;;  %1272 = vmatprep.subr.mxu1 %v1365_v0 }
  0x19   : > { %1260 = vmatmul.mubr.msk.f32.vlgmr.msra.gmra.mrb[2].mxu0 %vm284_vm0, %v291_v7 }
  0x1a   : > { %1265 = vmatmul.mubr.msk.f32.vlgmr.msra.gmra.mrb[2].mxu1 %vm284_vm0, %v292_v8  ;;  %1269 = vmatprep.mubr.msk.f32.mxu0 %vm1366_vm1, %v1365_v0 }
  0x1b   : > { %1274 = vmatprep.mubr.msk.f32.mxu1 %vm1366_vm1, %v1365_v0  ;;  %1268 = vmatpush3.msra.mxu0 %v297_v43 }
  0x1c   : > { %1277 = vmatprep.subr.mxu0 %v1365_v0  ;;  %1273 = vmatpush3.msra.mxu1 %v298_v44 }
  0x1d   : > { %1282 = vmatprep.subr.mxu1 %v1365_v0 }
  0xe8   : > { %v374_v10 = vpop.f32.mrb[0].mxu0  ;;  %v450_v11 = vpop.f32.mrb[0].mxu1 }
  0xe9   : > { %v606_v12 = vmul.f32 0.35355338, %v374_v10  ;;  %v1251_v13 = vpop.f32.mrb[1].mxu0  ;;  %v607_v14 = vmul.f32 0.35355338, %v450_v11  ;;  %v1256_v15 = vpop.f32.mrb[1].mxu1 }
  0xea   : > { %v674_v11 = vld [vmem:[#allocation3] sm:$0xff] }
  0xeb   : > { %v614_v16 = vsel %vm284_vm0, %v606_v12, -inf  ;;  %v617_v19 = vsel %vm284_vm0, %v607_v14, -inf }
  0xec   : > { %615 = vmax.xlane.f32.xlu0 %v614_v16  ;;  %v526_v17 = vpop.f32.mrb[2].mxu0 }
  0xed   : > { %v608_v18 = vmul.f32 0.35355338, %v526_v17  ;;  %v1261_v20 = vpop.f32.mrb[3].mxu0  ;;  %v602_v21 = vpop.f32.mrb[2].mxu1 }
  0xee   : > { %v609_v22 = vmul.f32 0.35355338, %v602_v21  ;;  %v1266_v23 = vpop.f32.mrb[3].mxu1 }
  0xef   : > { %v620_v24 = vsel %vm284_vm0, %v608_v18, -inf }
  0xf0   : > { %618 = vmax.xlane.f32.xlu0 %v617_v19  ;;  %621 = vmax.xlane.f32.xlu1 %v620_v24  ;;  %v623_v25 = vsel %vm284_vm0, %v609_v22, -inf }
  0xf4   : > { %624 = vmax.xlane.f32.xlu1 %v623_v25 }
 0x179   : > { %v616_v28 = vpop.xlane.xlu0 %615 }
 0x17a   : > { %v1470_v29 = vmax.f32 %v1467_v27, %v616_v28 }
 0x17c   : > { %v630_v32 = vsub.f32 %v1467_v27, %v1470_v29  ;;  %1031 = vst.msk [vmem:[#allocation2] sm:$0xff] %vm275_vm2, %v1470_v29  ;;  %644 = vperm.xlu0 %1315, %v1470_v29  }
 0x17d   : > { %v619_v33 = vpop.xlane.xlu0 %618  ;;  %v622_v34 = vpop.xlane.xlu1 %621 }
 0x17e   : > { %v627_v35 = vmax.f32 %v1472_v30, %v619_v33  ;;  %v628_v36 = vmax.f32 %v1474_v31, %v622_v34  ;;  %v634_v5 = vmul.f32 1.442695, %v630_v32 }
 0x180   : > { %v631_v38 = vsub.f32 %v1472_v30, %v627_v35  ;;  %1032 = vst.msk [vmem:[#allocation2 + $0x8] sm:$0xff] %vm275_vm2, %v627_v35  ;;  %649 = vperm.xlu1 %1316, %v627_v35   ;;  %v632_v39 = vsub.f32 %v1474_v31, %v628_v36  ;;  %1033 = vst.msk [vmem:[#allocation2 + $0x10] sm:$0xff] %vm275_vm2, %v628_v36  ;;  %v703_v35 = vld [vmem:[#allocation4] sm:$0xff] }
 0x181   : > { %v625_v40 = vpop.xlane.xlu1 %624 }
 0x182   : > { %v629_v41 = vmax.f32 %v1483_v37, %v625_v40  ;;  %v636_v3 = vmul.f32 1.442695, %v631_v38  ;;  %v704_v38 = vld [vmem:[#allocation4 + $0x8] sm:$0xff] }
 0x184   : > { %654 = vperm.xlu1 %1316, %v628_v36   ;;  %v633_v42 = vsub.f32 %v1483_v37, %v629_v41  ;;  %1034 = vst.msk [vmem:[#allocation2 + $0x18] sm:$0xff] %vm275_vm2, %v629_v41 }
 0x186   : > { %v640_v6 = vmul.f32 1.442695, %v633_v42 }
 0x188   : > { %659 = vperm.xlu1 %1316, %v629_v41  }
 0x1fb   : > { %v645_v45 = vpop.permute.xlu0 %644 }
 0x1fc   : > { %v662_v46 = vsub.f32 %v606_v12, %v645_v45  ;;  %v705_v45 = vld [vmem:[#allocation4 + $0x10] sm:$0xff] }
 0x1fe   : > { %v666_v47 = vmul.f32 1.442695, %v662_v46 }
 0x1ff   : > { %v650_v48 = vpop.permute.xlu1 %649 }
 0x200   : > { %1317 = vpow2.f32 %v666_v47  ;;  %v663_v49 = vsub.f32 %v607_v14, %v650_v48  ;;  %v675_v14 = vld [vmem:[#allocation3 + $0x8] sm:$0xff] }
 0x202   : > { %v668_v50 = vmul.f32 1.442695, %v663_v49 }
 0x203   : > { %v655_v51 = vpop.permute.xlu1 %654 }
 0x204   : > { %1319 = vpow2.f32 %v668_v50  ;;  %v664_v52 = vsub.f32 %v608_v18, %v655_v51  ;;  %v676_v18 = vld [vmem:[#allocation3 + $0x10] sm:$0xff]  ;;  %v706_v50 = vld [vmem:[#allocation4 + $0x18] sm:$0xff] }
 0x206   : > { %v670_v53 = vmul.f32 1.442695, %v664_v52 }
 0x207   : > { %v660_v54 = vpop.permute.xlu1 %659 }
 0x208   : > { %1321 = vpow2.f32 %v670_v53  ;;  %v665_v55 = vsub.f32 %v609_v22, %v660_v54  ;;  %v677_v22 = vld [vmem:[#allocation3 + $0x18] sm:$0xff] }
 0x20a   : > { %v1318_v57 = vpop.eup %1317  ;;  %v672_v58 = vmul.f32 1.442695, %v665_v55 }
 0x20b   : > { %1270 = vmatmul.mubr.msk.f32.vlgmr.msra.gmra.mrb[4].mxu0 %vm284_vm0, %v1318_v57  ;;  %v682_v59 = vsel %vm284_vm0, %v1318_v57, 0.0 }
 0x20c   : > { %1323 = vpow2.f32 %v672_v58  ;;  %683 = vadd.xlane.f32.xlu1 %v682_v59  ;;  %1278 = vmatpush3.msra.mxu0 %v299_v56 }
 0x20d   : > { %1279 = vmatprep.mubr.msk.f32.mxu0 %vm1366_vm1, %v1365_v0  ;;  %1325 = vpow2.f32 %v636_v3 }
 0x20e   : > { %v1320_v61 = vpop.eup %1319  ;;  %1327 = vpow2.f32 %v634_v5 }
 0x20f   : > { %1275 = vmatmul.mubr.msk.f32.vlgmr.msra.gmra.mrb[4].mxu1 %vm284_vm0, %v1320_v61  ;;  %v685_v62 = vsel %vm284_vm0, %v1320_v61, 0.0 }
 0x210   : > { %686 = vadd.xlane.f32.xlu0 %v685_v62  ;;  %1283 = vmatpush3.msra.mxu1 %v300_v60 }
 0x211   : > { %1284 = vmatprep.mubr.msk.f32.mxu1 %vm1366_vm1, %v1365_v0  ;;  %v638_v0 = vmul.f32 1.442695, %v632_v39 }
 0x212   : > { %v1322_v63 = vpop.eup %1321 }
 0x213   : > { %1280 = vmatmul.mubr.msk.f32.vlgmr.msra.gmra.mrb[6].mxu0 %vm284_vm0, %v1322_v63  ;;  %v688_v1 = vsel %vm284_vm0, %v1322_v63, 0.0  ;;  %1329 = vpow2.f32 %v638_v0 }
 0x214   : > { %689 = vadd.xlane.f32.xlu1 %v688_v1  ;;  %1331 = vpow2.f32 %v640_v6 }
 0x216   : > { %v1324_v2 = vpop.eup %1323 }
 0x217   : > { %1285 = vmatmul.mubr.msk.f32.vlgmr.msra.gmra.mrb[6].mxu1 %vm284_vm0, %v1324_v2  ;;  %v691_v4 = vsel %vm284_vm0, %v1324_v2, 0.0  ;;  %v1326_v7 = vpop.eup %1325 }
 0x218   : > { %692 = vadd.xlane.f32.xlu1 %v691_v4  ;;  %v1328_v8 = vpop.eup %1327  ;;  %v679_v16 = vmul.f32 %v1326_v7, %v675_v14 }
 0x219   : > { %v678_v12 = vmul.f32 %v1328_v8, %v674_v11 }
 0x21d   : > { %v1330_v9 = vpop.eup %1329 }
 0x21e   : > { %v1332_v10 = vpop.eup %1331  ;;  %v680_v20 = vmul.f32 %v1330_v9, %v676_v18 }
 0x21f   : > { %v681_v25 = vmul.f32 %v1332_v10, %v677_v22 }
 0x226   : > { %714 = vperm.xlu0 %1315, %v1326_v7  }
 0x229   : > { %709 = vperm.xlu1 %1316, %v1328_v8  }
 0x22d   : > { %719 = vperm.xlu1 %1316, %v1330_v9  }
 0x231   : > { %724 = vperm.xlu1 %1316, %v1332_v10  }
 0x299   : > { %v684_v13 = vpop.xlane.xlu1 %683 }
 0x29a   : > { %v694_v15 = vadd.f32 %v684_v13, %v678_v12 }
 0x29c   : > { %699 = vst.msk [vmem:[#allocation3] sm:$0xff] %vm275_vm2, %v694_v15 }
 0x29d   : > { %v687_v17 = vpop.xlane.xlu0 %686 }
 0x29e   : > { %v695_v19 = vadd.f32 %v687_v17, %v679_v16 }
 0x2a0   : > { %700 = vst.msk [vmem:[#allocation3 + $0x8] sm:$0xff] %vm275_vm2, %v695_v19 }
 0x2a1   : > { %v690_v21 = vpop.xlane.xlu1 %689 }
 0x2a2   : > { %v696_v23 = vadd.f32 %v690_v21, %v680_v20 }
 0x2a3   : > { %v1042_v24 = vld [vmem:[#allocation3] sm:$0xff] }
 0x2a4   : > { %701 = vst.msk [vmem:[#allocation3 + $0x10] sm:$0xff] %vm275_vm2, %v696_v23  ;;  %1333 = vrcp.f32 %v1042_v24 }
 0x2a5   : > { %v693_v26 = vpop.xlane.xlu1 %692  ;;  %v715_v39 = vpop.permute.xlu0 %714 }
 0x2a6   : > { %v697_v27 = vadd.f32 %v693_v26, %v681_v25  ;;  %v728_v44 = vmul.f32 %v715_v39, %v704_v38 }
 0x2a7   : > { %v1043_v28 = vld [vmem:[#allocation3 + $0x8] sm:$0xff] }
 0x2a8   : > { %702 = vst.msk [vmem:[#allocation3 + $0x18] sm:$0xff] %vm275_vm2, %v697_v27  ;;  %1335 = vrcp.f32 %v1043_v28 }
 0x2a9   : > { %v710_v36 = vpop.permute.xlu1 %709 }
 0x2aa   : > { %v727_v37 = vmul.f32 %v710_v36, %v703_v35 }
 0x2ab   : > { %v1044_v29 = vld [vmem:[#allocation3 + $0x10] sm:$0xff] }
 0x2ac   : > { %1337 = vrcp.f32 %v1044_v29 }
 0x2ad   : > { %v720_v43 = vpop.permute.xlu1 %719 }
 0x2ae   : > { %v1334_v30 = vpop.eup %1333  ;;  %v729_v49 = vmul.f32 %v720_v43, %v705_v45 }
 0x2af   : > { %1052 = vperm.xlu1 %1316, %v1334_v30   ;;  %v1045_v31 = vld [vmem:[#allocation3 + $0x18] sm:$0xff] }
 0x2b0   : > { %1339 = vrcp.f32 %v1045_v31 }
 0x2b1   : > { %v725_v51 = vpop.permute.xlu1 %724 }
 0x2b2   : > { %v1336_v32 = vpop.eup %1335  ;;  %v730_v55 = vmul.f32 %v725_v51, %v706_v50 }
 0x2b3   : > { %1057 = vperm.xlu0 %1315, %v1336_v32  }
 0x2b6   : > { %v1338_v33 = vpop.eup %1337 }
 0x2b7   : > { %1062 = vperm.xlu1 %1316, %v1338_v33  }
 0x2ba   : > { %v1340_v34 = vpop.eup %1339 }
 0x2bb   : > { %1067 = vperm.xlu0 %1315, %v1340_v34  }
 0x2de   : > { %v800_v40 = vpop.f32.mrb[4].mxu0 }
 0x2df   : > { %v1023_v41 = vadd.f32 %v800_v40, %v727_v37  ;;  %v1271_v42 = vpop.f32.mrb[5].mxu0 }
 0x2e1   : > { %1027 = vst.msk [vmem:[#allocation4] sm:$0xff] %vm284_vm0, %v1023_v41 }
 0x2e2   : > { %v873_v46 = vpop.f32.mrb[4].mxu1 }
 0x2e3   : > { %v1024_v47 = vadd.f32 %v873_v46, %v728_v44  ;;  %v1276_v48 = vpop.f32.mrb[5].mxu1 }
 0x2e5   : > { %1028 = vst.msk [vmem:[#allocation4 + $0x8] sm:$0xff] %vm284_vm0, %v1024_v47 }
 0x2e6   : > { %v946_v52 = vpop.f32.mrb[6].mxu0 }
 0x2e7   : > { %v1025_v53 = vadd.f32 %v946_v52, %v729_v49  ;;  %v1281_v54 = vpop.f32.mrb[7].mxu0 }
 0x2e8   : > { %v1038_v60 = vld [vmem:[#allocation4] sm:$0xff] }
 0x2e9   : > { %1029 = vst.msk [vmem:[#allocation4 + $0x10] sm:$0xff] %vm284_vm0, %v1025_v53 }
 0x2ea   : > { %v1019_v56 = vpop.f32.mrb[6].mxu1 }
 0x2eb   : > { %v1026_v57 = vadd.f32 %v1019_v56, %v730_v55  ;;  %v1286_v58 = vpop.f32.mrb[7].mxu1 }
 0x2ec   : > { %v1039_v62 = vld [vmem:[#allocation4 + $0x8] sm:$0xff] }
 0x2ed   : > { %1030 = vst.msk [vmem:[#allocation4 + $0x18] sm:$0xff] %vm284_vm0, %v1026_v57 }
 0x2f0   : > { %v1040_v3 = vld [vmem:[#allocation4 + $0x10] sm:$0xff] }
 0x2f4   : > { %v1041_v0 = vld [vmem:[#allocation4 + $0x18] sm:$0xff] }
 0x32e   : > { %v1053_v59 = vpop.permute.xlu1 %1052 }
 0x32f   : > { %v1070_v61 = vmul.f32 %v1053_v59, %v1038_v60 }
 0x331   : > { %1074 = vst.msk [vmem:[%s270_s28] sm:$0xff] %vm284_vm0, %v1070_v61 }
 0x332   : > { %v1058_v63 = vpop.permute.xlu0 %1057 }
 0x333   : > { %v1071_v1 = vmul.f32 %v1058_v63, %v1039_v62 }
 0x335   : > { %1075 = vst.msk [vmem:[%s270_s28 + $0x8] sm:$0xff] %vm284_vm0, %v1071_v1 }
 0x336   : > { %v1063_v2 = vpop.permute.xlu1 %1062 }
 0x337   : > { %v1072_v4 = vmul.f32 %v1063_v2, %v1040_v3 }
 0x339   : > { %1076 = vst.msk [vmem:[%s270_s28 + $0x10] sm:$0xff] %vm284_vm0, %v1072_v4 }
 0x33a   : > { %v1068_v5 = vpop.permute.xlu0 %1067 }
 0x33b   : > { %v1073_v6 = vmul.f32 %v1068_v5, %v1041_v0 }
 0x33d   : > { %1077 = vst.msk [vmem:[%s270_s28 + $0x18] sm:$0xff] %vm284_vm0, %v1073_v6 }
 0x33e PF: > { %s13_s14 = sadd.s32 1, %s1363_s14   ;;  %s1542_s12 = smov %s1359_s13 }
 0x33f   : > { %p10_p5 = scmp.ge.s32.totalorder %s13_s14, 4   ;;  %s1543_s13 = smov %s1545_s15 }
 0x341   :  { %12 = sbr.rel (!%p10_p5) target bundleno = 2 (0x2), region = 76 }

// kernel: decoder_forward.23
= control target key start
LH: loop header
LB: loop body
LE: loop exit
PB: predicated region body
PF: predicated region fallthrough
CT: control target
= control target key end

     0   :  { %vm33_vm0 = vcmask 261120   ;;  %v381_v20 = vmov 0.0   ;;  %vm143_vm1 = vcmask 523264   ;;  %s505_s1 = inlined_call_operand.vmem [shape: f32[32,64], index: 1, kind: input, shape index: {}]   ;;  %s506_s0 = inlined_call_operand.vmem [shape: f32[16,32], index: 0, kind: input, shape index: {}, may-alias: {0,5}]   ;;  %s507_s3 = inlined_call_operand.vmem [shape: f32[64,32], index: 3, kind: input, shape index: {}]   ;;  %s508_s2 = inlined_call_operand.vmem [shape: f32[1,64], index: 2, kind: input, shape index: {}]   ;;  %s509_s4 = inlined_call_operand.vmem [shape: f32[1,32], index: 4, kind: input, shape index: {}]   ;;  %s510_s5 = inlined_call_operand.vmem [shape: f32[16,32], index: 5, kind: input, shape index: {}, may-alias: {0,5}]   ;;  %s511_s6 = inlined_call_operand.vmem [shape: f32[1,32], index: 6, kind: input, shape index: {}]   ;;  %s512_s7 = inlined_call_operand.vmem [shape: f32[1,32], index: 7, kind: input, shape index: {}]   ;;  %s513_s8 = inlined_call_operand.vmem [shape: f32[16,32], index: 8, kind: output, shape index: {}]  }
   0x1   :  { %v38_v0 = vld [vmem:[%s505_s1] sm:$0xff]  ;;  %v39_v1 = vld [vmem:[%s505_s1 + $0x8] sm:$0xff]  ;;  %v40_v2 = vld [vmem:[%s505_s1 + $0x10] sm:$0xff]  ;;  %35 = vst.msk [vmem:[#allocation2 + $0x8] sm:$0xff] %vm33_vm0, %v381_v20 }
   0x2   :  { %v352_v3 = vpack.c.bf16 %v39_v1, %v38_v0  ;;  %v41_v4 = vld [vmem:[%s505_s1 + $0x18] sm:$0xff]  ;;  %v36_v5 = vld [vmem:[%s506_s0] sm:$0xff]  ;;  %v136_v8 = vld [vmem:[%s507_s3 + $0x8] sm:$0xff]  ;;  %34 = vst.msk [vmem:[#allocation2] sm:$0xff] %vm33_vm0, %v381_v20 }
   0x3   :  { %v356_v6 = vpack.c.bf16 %v41_v4, %v40_v2  ;;  %330 = vmatprep.mubr.msk.f32.mxu0 %vm33_vm0, %v36_v5  ;;  %v135_v7 = vld [vmem:[%s507_s3] sm:$0xff]  ;;  %v137_v9 = vld [vmem:[%s507_s3 + $0x10] sm:$0xff]  ;;  %v138_v11 = vld [vmem:[%s507_s3 + $0x18] sm:$0xff] }
   0x4   :  { %353 = vmatprep.subr.bf16.mxu0 %v352_v3  ;;  %v360_v10 = vpack.c.bf16 %v136_v8, %v135_v7  ;;  %v364_v12 = vpack.c.bf16 %v138_v11, %v137_v9  ;;  %v139_v13 = vld [vmem:[%s507_s3 + $0x20] sm:$0xff]  ;;  %v140_v14 = vld [vmem:[%s507_s3 + $0x28] sm:$0xff]  ;;  %v141_v17 = vld [vmem:[%s507_s3 + $0x30] sm:$0xff] }
   0x5   :  { %355 = vmatpush3.bf16.msra.mxu0 %v352_v3  ;;  %v368_v15 = vpack.c.bf16 %v140_v14, %v139_v13  ;;  %v37_v16 = vld [vmem:[%s506_s0 + $0x8] sm:$0xff]  ;;  %v142_v18 = vld [vmem:[%s507_s3 + $0x38] sm:$0xff]  ;;  %v298_v21 = vld [vmem:[%s508_s2] ss:$0 sm:$0xff] }
   0x6   :  { %357 = vmatprep.subr.bf16.mxu0 %v356_v6  ;;  %361 = vmatprep.subr.bf16.mxu1 %v360_v10  ;;  %v372_v19 = vpack.c.bf16 %v142_v18, %v141_v17  ;;  %v303_v34 = vld [vmem:[%s509_s4] ss:$0 sm:$0xff]  ;;  %v244_v40 = vld [vmem:[%s510_s5 + $0x8] sm:$0xff] }
   0x7   :  { %363 = vmatpush3.bf16.msra.mxu1 %v360_v10  ;;  %v243_v37 = vld [vmem:[%s510_s5] sm:$0xff] }
   0x8   :  { %365 = vmatprep.subr.bf16.mxu1 %v364_v12  ;;  %v134_v28 = vld [vmem:[#allocation2 + $0x8] sm:$0xff]  ;;  %v304_v62 = vld [vmem:[%s511_s6] ss:$0 sm:$0xff] }
   0x9   :  { %359 = vmatpush3.bf16.msra.mxu0 %v356_v6  ;;  %v133_v29 = vld [vmem:[#allocation2] sm:$0xff] }
   0xa   :  { %v305_v0 = vld [vmem:[%s512_s7] ss:$0 sm:$0xff] }
   0xb   :  { %367 = vmatpush3.bf16.msra.mxu1 %v364_v12 }
   0xc   :  { %331 = vmatmul.mubr.msk.f32.vlgmr.msra.gmra.mrb[0].mxu0 %vm33_vm0, %v37_v16  ;;  %369 = vmatprep.subr.bf16.mxu1 %v368_v15 }
   0xf   :  { %371 = vmatpush3.bf16.msra.mxu1 %v368_v15 }
  0x10   :  { %373 = vmatprep.subr.bf16.mxu1 %v372_v19 }
  0x13   :  { %375 = vmatpush3.bf16.msra.mxu1 %v372_v19 }
  0xdf   :  { %v332_v22 = vpop.f32.mrb[0].mxu0 }
  0xe0   :  { %v128_v23 = vadd.f32 %v332_v22, %v298_v21  ;;  %v122_v24 = vpop.f32.mrb[1].mxu0 }
  0xe1   :  { %v123_v25 = vadd.f32 %v298_v21, %v122_v24 }
  0xe2   :  { %v132_v27 = vmax.f32 %v128_v23, 0.0 }
  0xe3   :  { %v131_v26 = vmax.f32 %v123_v25, 0.0 }
  0xe5   :  { %349 = vmatprep.mubr.msk.f32.mxu1 %vm143_vm1, %v131_v26 }
  0xe6   :  { %350 = vmatmul.mubr.msk.f32.vlgmr.msra.gmra.mrb[0].mxu1 %vm143_vm1, %v132_v27 }
 0x1b9   :  { %v351_v30 = vpop.f32.mrb[0].mxu1 }
 0x1ba   :  { %v226_v31 = vadd.f32 %v351_v30, %v134_v28  ;;  %v216_v32 = vpop.f32.mrb[1].mxu1 }
 0x1bb   :  { %v225_v33 = vadd.f32 %v216_v32, %v133_v29 }
 0x1bc   :  { %228 = vst.msk [vmem:[#allocation2 + $0x8] sm:$0xff] %vm33_vm0, %v226_v31 }
 0x1bd   :  { %227 = vst.msk [vmem:[#allocation2] sm:$0xff] %vm33_vm0, %v225_v33 }
 0x1c3   :  { %v233_v35 = vld [vmem:[#allocation2 + $0x8] sm:$0xff] }
 0x1c4   :  { %v232_v36 = vld [vmem:[#allocation2] sm:$0xff]  ;;  %v242_v39 = vadd.f32 %v303_v34, %v233_v35 }
 0x1c5   :  { %v241_v38 = vadd.f32 %v303_v34, %v232_v36 }
 0x1c6   :  { %v246_v43 = vadd.f32 %v244_v40, %v242_v39 }
 0x1c7   :  { %v245_v41 = vadd.f32 %v243_v37, %v241_v38 }
 0x1c8   :  { %v250_v44 = vsel %vm33_vm0, %v246_v43, 0.0 }
 0x1c9   :  { %v247_v42 = vsel %vm33_vm0, %v245_v41, 0.0 }
 0x1ca   :  { %248 = vadd.xlane.f32.xlu0 %v247_v42 }
 0x1ce   :  { %251 = vadd.xlane.f32.xlu0 %v250_v44 }
 0x257   :  { %v249_v45 = vpop.xlane.xlu0 %248 }
 0x258   :  { %v254_v46 = vmul.f32 0.03125, %v249_v45 }
 0x25a   :  { %v256_v47 = vsub.f32 %v245_v41, %v254_v46 }
 0x25b   :  { %v252_v48 = vpop.xlane.xlu0 %251 }
 0x25c   :  { %v255_v49 = vmul.f32 0.03125, %v252_v48  ;;  %v258_v50 = vmul.f32 %v256_v47, %v256_v47 }
 0x25e   :  { %v257_v51 = vsub.f32 %v246_v43, %v255_v49  ;;  %v260_v52 = vsel %vm33_vm0, %v258_v50, 0.0 }
 0x25f   :  { %261 = vadd.xlane.f32.xlu1 %v260_v52 }
 0x260   :  { %v259_v53 = vmul.f32 %v257_v51, %v257_v51 }
 0x262   :  { %v263_v54 = vsel %vm33_vm0, %v259_v53, 0.0 }
 0x263   :  { %264 = vadd.xlane.f32.xlu1 %v263_v54 }
 0x2ec   :  { %v262_v55 = vpop.xlane.xlu1 %261 }
 0x2ed   :  { %v266_v56 = vmul.f32 0.03125, %v262_v55 }
 0x2ef   :  { %v268_v57 = vadd.f32 1e-05, %v266_v56 }
 0x2f0   :  { %v265_v58 = vpop.xlane.xlu1 %264 }
 0x2f1   :  { %377 = vrsqrt.f32 %v268_v57  ;;  %v267_v59 = vmul.f32 0.03125, %v265_v58 }
 0x2f3   :  { %v269_v60 = vadd.f32 1e-05, %v267_v59 }
 0x2f5   :  { %379 = vrsqrt.f32 %v269_v60 }
 0x2fb   :  { %v378_v61 = vpop.eup %377 }
 0x2fc   :  { %v272_v63 = vmul.f32 %v378_v61, %v256_v47 }
 0x2fe   :  { %v281_v1 = vmul.f32 %v304_v62, %v272_v63 }
 0x2ff   :  { %v380_v2 = vpop.eup %379 }
 0x300   :  { %v290_v3 = vadd.f32 %v305_v0, %v281_v1  ;;  %v273_v4 = vmul.f32 %v380_v2, %v257_v51 }
 0x302   :  { %292 = vst.msk [vmem:[%s513_s8] sm:$0xff] %vm33_vm0, %v290_v3  ;;  %v282_v5 = vmul.f32 %v304_v62, %v273_v4 }
 0x304   :  { %v291_v6 = vadd.f32 %v305_v0, %v282_v5 }
 0x306   :  { %293 = vst.msk [vmem:[%s513_s8 + $0x8] sm:$0xff] %vm33_vm0, %v291_v6 }

// kernel: decoder_forward.31
= control target key start
LH: loop header
LB: loop body
LE: loop exit
PB: predicated region body
PF: predicated region fallthrough
CT: control target
= control target key end

     0   :  { %vm34_vm0 = vcmask 261120   ;;  %s554_s0 = inlined_call_operand.vmem [shape: f32[16,32], index: 0, kind: input, shape index: {}, may-alias: {0,5}]   ;;  %s555_s1 = inlined_call_operand.vmem [shape: f32[32,64], index: 1, kind: input, shape index: {}]   ;;  %s556_s2 = inlined_call_operand.vmem [shape: f32[1,64], index: 2, kind: input, shape index: {}]   ;;  %s557_s3 = inlined_call_operand.vmem [shape: f32[64,32], index: 3, kind: input, shape index: {}]   ;;  %s558_s4 = inlined_call_operand.vmem [shape: f32[1,32], index: 4, kind: input, shape index: {}]   ;;  %s559_s5 = inlined_call_operand.vmem [shape: f32[16,32], index: 5, kind: input, shape index: {}, may-alias: {0,5}]   ;;  %s560_s6 = inlined_call_operand.vmem [shape: f32[1,32], index: 6, kind: input, shape index: {}]   ;;  %s561_s7 = inlined_call_operand.vmem [shape: f32[1,32], index: 7, kind: input, shape index: {}]   ;;  %s562_s8 = inlined_call_operand.hbm [shape: f32[16,32], index: 8, kind: output, shape index: {}]  }
   0x1   :  { %v39_v0 = vld [vmem:[%s555_s1] sm:$0xff]  ;;  %v40_v1 = vld [vmem:[%s555_s1 + $0x8] sm:$0xff]  ;;  %v41_v2 = vld [vmem:[%s555_s1 + $0x10] sm:$0xff] }
   0x2   :  { %v365_v3 = vpack.c.bf16 %v40_v1, %v39_v0  ;;  %v42_v4 = vld [vmem:[%s555_s1 + $0x18] sm:$0xff]  ;;  %v37_v5 = vld [vmem:[%s554_s0] sm:$0xff]  ;;  %v137_v8 = vld [vmem:[%s557_s3 + $0x8] sm:$0xff] }
   0x3   :  { %v369_v6 = vpack.c.bf16 %v42_v4, %v41_v2  ;;  %343 = vmatprep.mubr.msk.f32.mxu0 %vm34_vm0, %v37_v5  ;;  %v136_v7 = vld [vmem:[%s557_s3] sm:$0xff]  ;;  %v138_v9 = vld [vmem:[%s557_s3 + $0x10] sm:$0xff]  ;;  %v139_v11 = vld [vmem:[%s557_s3 + $0x18] sm:$0xff] }
   0x4   :  { %366 = vmatprep.subr.bf16.mxu0 %v365_v3  ;;  %v373_v10 = vpack.c.bf16 %v137_v8, %v136_v7  ;;  %v377_v12 = vpack.c.bf16 %v139_v11, %v138_v9  ;;  %v140_v13 = vld [vmem:[%s557_s3 + $0x20] sm:$0xff]  ;;  %v141_v14 = vld [vmem:[%s557_s3 + $0x28] sm:$0xff] }
   0x5   :  { %368 = vmatpush3.bf16.msra.mxu0 %v365_v3 }
   0x6   :  { %13 = vsyncpa [#allocation4], 0  ;;  %370 = vmatprep.subr.bf16.mxu0 %v369_v6  ;;  %374 = vmatprep.subr.bf16.mxu1 %v373_v10  ;;  %v381_v15 = vpack.c.bf16 %v141_v14, %v140_v13  ;;  %v38_v16 = vld [vmem:[%s554_s0 + $0x8] sm:$0xff]  ;;  %v142_v17 = vld [vmem:[%s557_s3 + $0x30] sm:$0xff]  ;;  %v421_v20 = vmov 0.0   ;;  %vm144_vm1 = vcmask 523264  }
   0x7   :  { %376 = vmatpush3.bf16.msra.mxu1 %v373_v10  ;;  %v143_v18 = vld [vmem:[%s557_s3 + $0x38] sm:$0xff]  ;;  %36 = vst.msk [vmem:[#allocation2 + $0x8] sm:$0xff] %vm34_vm0, %v421_v20  ;;  %35 = vst.msk [vmem:[#allocation2] sm:$0xff] %vm34_vm0, %v421_v20  ;;  %v311_v21 = vld [vmem:[%s556_s2] ss:$0 sm:$0xff]  ;;  %s422_s17 = smov [#allocation3]  }
   0x8   :  { %378 = vmatprep.subr.bf16.mxu1 %v377_v12  ;;  %v385_v19 = vpack.c.bf16 %v143_v18, %v142_v17  ;;  %v316_v34 = vld [vmem:[%s558_s4] ss:$0 sm:$0xff]  ;;  %v245_v40 = vld [vmem:[%s559_s5 + $0x8] sm:$0xff]  ;;  %s300_s18 = sshll.u32 %s422_s17, 4  ;;  %s301_s18 = int_to_ptr.vmem [resolvable:$true] %s300_s18 }
   0x9   :  { %372 = vmatpush3.bf16.msra.mxu0 %v369_v6  ;;  %v244_v37 = vld [vmem:[%s559_s5] sm:$0xff]  ;;  %s397_s19 = scalar_lea.vmem %s301_s18, 256  ;;  %p402_p1 = scmp.lt.s32.totalorder %s301_s18, %s301_s18 }
   0xa   :  { %v317_v62 = vld [vmem:[%s560_s6] ss:$0 sm:$0xff]  ;;  %p398_p0 = scmp.ne.s32.totalorder %s301_s18, %s397_s19  ;;  %p403_p2 = scmp.lt.s32.totalorder %s397_s19, %s397_s19 }
   0xb   :  { %380 = vmatpush3.bf16.msra.mxu1 %v377_v12  ;;  %v318_v0 = vld [vmem:[%s561_s7] ss:$0 sm:$0xff] }
   0xc   :  { %344 = vmatmul.mubr.msk.f32.vlgmr.msra.gmra.mrb[0].mxu0 %vm34_vm0, %v38_v16  ;;  %382 = vmatprep.subr.bf16.mxu1 %v381_v15  ;;  %p404_p3 = por %p403_p2, %p402_p1 }
   0xe   :  { %v135_v28 = vld [vmem:[#allocation2 + $0x8] sm:$0xff]  ;;  %v134_v29 = vld [vmem:[#allocation2] sm:$0xff]  ;;  %p405_p4 = pnand %p404_p3, %p398_p0 }
   0xf   :  { %384 = vmatpush3.bf16.msra.mxu1 %v381_v15 }
  0x10   :  { %386 = vmatprep.subr.bf16.mxu1 %v385_v19 }
  0x13   :  { %388 = vmatpush3.bf16.msra.mxu1 %v385_v19 }
  0xdf   :  { %v345_v22 = vpop.f32.mrb[0].mxu0 }
  0xe0   :  { %v129_v23 = vadd.f32 %v345_v22, %v311_v21  ;;  %v123_v24 = vpop.f32.mrb[1].mxu0 }
  0xe1   :  { %v124_v25 = vadd.f32 %v311_v21, %v123_v24 }
  0xe2   :  { %v133_v27 = vmax.f32 %v129_v23, 0.0 }
  0xe3   :  { %v132_v26 = vmax.f32 %v124_v25, 0.0 }
  0xe5   :  { %362 = vmatprep.mubr.msk.f32.mxu1 %vm144_vm1, %v132_v26 }
  0xe6   :  { %363 = vmatmul.mubr.msk.f32.vlgmr.msra.gmra.mrb[0].mxu1 %vm144_vm1, %v133_v27 }
 0x1b9   :  { %v364_v30 = vpop.f32.mrb[0].mxu1 }
 0x1ba   :  { %v227_v31 = vadd.f32 %v364_v30, %v135_v28  ;;  %v217_v32 = vpop.f32.mrb[1].mxu1 }
 0x1bb   :  { %v226_v33 = vadd.f32 %v217_v32, %v134_v29 }
 0x1bc   :  { %229 = vst.msk [vmem:[#allocation2 + $0x8] sm:$0xff] %vm34_vm0, %v227_v31 }
 0x1bd   :  { %228 = vst.msk [vmem:[#allocation2] sm:$0xff] %vm34_vm0, %v226_v33 }
 0x1c3   :  { %v234_v35 = vld [vmem:[#allocation2 + $0x8] sm:$0xff] }
 0x1c4   :  { %v233_v36 = vld [vmem:[#allocation2] sm:$0xff]  ;;  %v243_v39 = vadd.f32 %v316_v34, %v234_v35 }
 0x1c5   :  { %v242_v38 = vadd.f32 %v316_v34, %v233_v36 }
 0x1c6   :  { %v247_v43 = vadd.f32 %v245_v40, %v243_v39 }
 0x1c7   :  { %v246_v41 = vadd.f32 %v244_v37, %v242_v38 }
 0x1c8   :  { %v251_v44 = vsel %vm34_vm0, %v247_v43, 0.0 }
 0x1c9   :  { %v248_v42 = vsel %vm34_vm0, %v246_v41, 0.0 }
 0x1ca   :  { %249 = vadd.xlane.f32.xlu0 %v248_v42 }
 0x1ce   :  { %252 = vadd.xlane.f32.xlu0 %v251_v44 }
 0x257   :  { %v250_v45 = vpop.xlane.xlu0 %249 }
 0x258   :  { %v255_v46 = vmul.f32 0.03125, %v250_v45 }
 0x25a   :  { %v257_v47 = vsub.f32 %v246_v41, %v255_v46 }
 0x25b   :  { %v253_v48 = vpop.xlane.xlu0 %252 }
 0x25c   :  { %v256_v49 = vmul.f32 0.03125, %v253_v48  ;;  %v259_v50 = vmul.f32 %v257_v47, %v257_v47 }
 0x25e   :  { %v258_v51 = vsub.f32 %v247_v43, %v256_v49  ;;  %v261_v52 = vsel %vm34_vm0, %v259_v50, 0.0 }
 0x25f   :  { %262 = vadd.xlane.f32.xlu1 %v261_v52 }
 0x260   :  { %v260_v53 = vmul.f32 %v258_v51, %v258_v51 }
 0x262   :  { %v264_v54 = vsel %vm34_vm0, %v260_v53, 0.0 }
 0x263   :  { %265 = vadd.xlane.f32.xlu1 %v264_v54 }
 0x2ec   :  { %v263_v55 = vpop.xlane.xlu1 %262 }
 0x2ed   :  { %v267_v56 = vmul.f32 0.03125, %v263_v55 }
 0x2ef   :  { %v269_v57 = vadd.f32 1e-05, %v267_v56 }
 0x2f0   :  { %v266_v58 = vpop.xlane.xlu1 %265 }
 0x2f1   :  { %393 = vrsqrt.f32 %v269_v57  ;;  %v268_v59 = vmul.f32 0.03125, %v266_v58 }
 0x2f3   :  { %v270_v60 = vadd.f32 1e-05, %v268_v59 }
 0x2f5   :  { %395 = vrsqrt.f32 %v270_v60 }
 0x2fb   :  { %v394_v61 = vpop.eup %393 }
 0x2fc   :  { %v273_v63 = vmul.f32 %v394_v61, %v257_v47 }
 0x2fe   :  { %v282_v1 = vmul.f32 %v317_v62, %v273_v63 }
 0x2ff   :  { %v396_v2 = vpop.eup %395 }
 0x300   :  { %v274_v3 = vmul.f32 %v396_v2, %v258_v51  ;;  %v291_v4 = vadd.f32 %v318_v0, %v282_v1 }
 0x302   :  { %v283_v5 = vmul.f32 %v317_v62, %v274_v3  ;;  %293 = vst.msk [vmem:[#allocation3] sm:$0xff] %vm34_vm0, %v291_v4 }
 0x304   :  { %v292_v6 = vadd.f32 %v318_v0, %v283_v5 }
 0x306   :  { %294 = vst.msk [vmem:[#allocation3 + $0x8] sm:$0xff] %vm34_vm0, %v292_v6 }
 0x307   :  { %408 = shalt.err (!%p405_p4)
}
 0x308   :  { %s409_s20 = scalar_lea.hbm %s562_s8, 256 }
 0x309   :  { %p410_p5 = scmp.ne.s32.totalorder %s562_s8, %s409_s20  ;;  %p413_p6 = scmp.lt.u32.totalorder %s409_s20, %s562_s8 }
 0x30b   :  { %p415_p7 = pnand %p413_p6, %p410_p5 }
 0x30d   :  { %418 = shalt.err (!%p415_p7)
}
 0x30e   :  { %s423_s24 = smov 128   ;;  %s424_s25 = smov 8  }
 0x30f   :  { %306 = dma.vmem_to_hbm [thread:$0]  %s301_s18, 256, %s562_s8, [#allocation4], %s423_s24, %s423_s24, %s424_s25  }
 0x310   :  { %419 = dma.done.wait [#allocation4], 256  }
 0x311   :  { %420 = vsyncadd [#allocation4], 4294967040 }
 0x312   :  { %310 = vsyncpa [#allocation4], 1 }

</bundles_post_ra>
